<compile_context>
chip_gen: v5e
topology: v5e:2x2
jax: 0.10.0
libtpu: 0.0.40
codegen_flags: <defaults>
</compile_context>

<pallas_src>
import jax
import jax.numpy as jnp
from jax.experimental import pallas as pl
from jax.experimental.pallas import tpu as pltpu


def _swish(h):
    return h * jax.nn.sigmoid(h)


def _member_kernel(x_ref, w1_ref, bst_ref, w2_ref, w3_ref, w4_ref,
                   w5m_ref, b5m_ref, w5v_ref, b5v_ref,
                   max_lv_ref, min_lv_ref,
                   mean_ref, var_ref):
    """One grid step == one ensemble member (weights for the next member DMA in parallel)."""
    f32 = jnp.float32

    h = _swish(jnp.dot(x_ref[...], w1_ref[...], preferred_element_type=f32)
               + bst_ref[0:1, :])
    h = _swish(jnp.dot(h, w2_ref[...].astype(f32), preferred_element_type=f32)
               + bst_ref[1:2, :])
    h = _swish(jnp.dot(h, w3_ref[...].astype(f32), preferred_element_type=f32)
               + bst_ref[2:3, :])
    h = _swish(jnp.dot(h, w4_ref[...].astype(f32), preferred_element_type=f32)
               + bst_ref[3:4, :])

    # Split output head (built once at prep time): lane-clean matmuls and stores.
    mean = jnp.dot(h, w5m_ref[...], preferred_element_type=f32) + b5m_ref[...]
    raw_lv = jnp.dot(h, w5v_ref[...], preferred_element_type=f32) + b5v_ref[...]

    max_lv = max_lv_ref[...]
    min_lv = min_lv_ref[...]
    logvar = max_lv - jax.nn.softplus(max_lv - raw_lv)
    logvar = min_lv + jax.nn.softplus(logvar - min_lv)

    mean_ref[...] = mean
    var_ref[...] = jnp.exp(logvar)


def _round_up(n, m):
    return ((n + m - 1) // m) * m


def _pad_axis(a, axis, target):
    pad = target - a.shape[axis]
    if pad <= 0:
        return a
    widths = [(0, 0)] * a.ndim
    widths[axis] = (0, pad)
    return jnp.pad(a, widths)


def prepare_params(params, max_logvar, min_logvar):
    """One-time parameter preparation (cache the result; do NOT call per forward)."""
    (w1, b1), (w2, b2), (w3, b3), (w4, b4), (w5, b5) = params
    half = w5.shape[-1] // 2
    f32, bf16 = jnp.float32, jnp.bfloat16
    return dict(
        w1=w1.astype(f32),                                  # (E, Din, H) tiny -> keep f32
        bstack=jnp.stack([b1, b2, b3, b4], axis=1).astype(f32),  # (E, 4, H)
        w2=w2.astype(bf16),                                 # (E, H, H)  weight bytes halved
        w3=w3.astype(bf16),
        w4=w4.astype(bf16),
        w5m=w5[:, :, :half].astype(f32),                    # (E, H, half)
        w5v=w5[:, :, half:].astype(f32),
        b5m=b5[:, None, :half].astype(f32),                 # (E, 1, half)
        b5v=b5[:, None, half:].astype(f32),
        max_lv=max_logvar.astype(f32),                      # (1, half)
        min_lv=min_logvar.astype(f32),
    )


@jax.jit
def ensemble_forward(x, prep):
    """x: (E, B, S+A) float32, prep: output of prepare_params.
    Returns (mean, var), each (E, B, S+1)."""
    E, B, Din = x.shape
    H = prep["w1"].shape[-1]
    half = prep["w5m"].shape[-1]
    Bp = _round_up(B, 8)
    x_p = _pad_axis(x, 1, Bp)

    def per_member(*last2):
        # leading E dim squeezed out of the kernel ref; one block per grid step.
        return pl.BlockSpec((None,) + tuple(last2), lambda e: (e, 0, 0))

    shared = pl.BlockSpec((1, half), lambda e: (0, 0))       # same block every step

    in_specs = [
        per_member(Bp, Din),    # x
        per_member(Din, H),     # w1
        per_member(4, H),       # packed hidden biases
        per_member(H, H),       # w2 (bf16)
        per_member(H, H),       # w3 (bf16)
        per_member(H, H),       # w4 (bf16)
        per_member(H, half),    # w5 mean head
        per_member(1, half),    # b5 mean head
        per_member(H, half),    # w5 logvar head
        per_member(1, half),    # b5 logvar head
        shared,                 # max_logvar
        shared,                 # min_logvar
    ]
    out_specs = (per_member(Bp, half), per_member(Bp, half))

    mean_p, var_p = pl.pallas_call(
        _member_kernel,
        grid=(E,),
        in_specs=in_specs,
        out_specs=out_specs,
        out_shape=(
            jax.ShapeDtypeStruct((E, Bp, half), jnp.float32),
            jax.ShapeDtypeStruct((E, Bp, half), jnp.float32),
        ),
        compiler_params=pltpu.CompilerParams(dimension_semantics=("parallel",)),
    )(x_p, prep["w1"], prep["bstack"], prep["w2"], prep["w3"], prep["w4"],
      prep["w5m"], prep["b5m"], prep["w5v"], prep["b5v"],
      prep["max_lv"], prep["min_lv"])

    return mean_p[:, :B, :], var_p[:, :B, :]


def init_params(key, state_dim, action_dim, ensemble_size, hidden=200):
    """Deterministic init matching FCLayer shapes (truncated-normal weights, zero bias)."""
    dims = [state_dim + action_dim, hidden, hidden, hidden, hidden, (state_dim + 1) * 2]
    params = []
    for i in range(5):
        key, sub = jax.random.split(key)
        std = 1.0 / (2.0 * jnp.sqrt(jnp.float32(dims[i])))
        w = std * jax.random.truncated_normal(
            sub, -2.0, 2.0, (ensemble_size, dims[i], dims[i + 1]), dtype=jnp.float32)
        b = jnp.zeros((ensemble_size, dims[i + 1]), dtype=jnp.float32)
        params.append((w, b))
    return params


def reference_forward(x, params, max_lv, min_lv):
    """Pure-JAX reference of EnsembleModel.forward (return_log_var=False)."""
    h = x
    for i, (w, b) in enumerate(params):
        h = jnp.einsum("ebi,eio->ebo", h, w) + b[:, None, :]
        if i < 4:
            h = h * jax.nn.sigmoid(h)
    half = h.shape[-1] // 2
    mean = h[:, :, :half]
    logvar = max_lv - jax.nn.softplus(max_lv - h[:, :, half:])
    logvar = min_lv + jax.nn.softplus(logvar - min_lv)
    return mean, jnp.exp(logvar)


if __name__ == "__main__":
    state_dim, action_dim = 4, 3
    ensemble_size = 5
    batch = 8
    out_half = state_dim + 1

    key = jax.random.PRNGKey(0)
    key, kx = jax.random.split(key)
    x = jax.random.normal(kx, (ensemble_size, batch, state_dim + action_dim), dtype=jnp.float32)

    params = init_params(key, state_dim, action_dim, ensemble_size)
    max_logvar = jnp.ones((1, out_half), dtype=jnp.float32) / 2.0
    min_logvar = -jnp.ones((1, out_half), dtype=jnp.float32) * 10.0

    # One-time preparation (cached across calls in real use).
    prep = prepare_params(params, max_logvar, min_logvar)
    jax.block_until_ready(prep)

    mean, var = ensemble_forward(x, prep)
    jax.block_until_ready((mean, var))

    # Reference uses the SAME bf16-rounded hidden weights the kernel consumes,
    # so the comparison isolates kernel correctness (not quantization error).
    ref_params = []
    for i, (w, b) in enumerate(params):
        if i in (1, 2, 3):
            w = w.astype(jnp.bfloat16).astype(jnp.float32)
        ref_params.append((w, b))
    ref_mean, ref_var = reference_forward(x, ref_params, max_logvar, min_logvar)

    assert jnp.allclose(mean, ref_mean, atol=1e-5, rtol=1e-5), "mean mismatch"
    assert jnp.allclose(var, ref_var, atol=1e-5, rtol=1e-5), "var mismatch"

    print("KERNEL_OK")
</pallas_src>

<mosaic_0001>
module attributes {stable_mosaic.version = 11 : i64} {
  func.func @_member_kernel(%arg0: i32, %arg1: memref<1x8x7xf32, #tpu.memory_space<vmem>>, %arg2: memref<1x7x200xf32, #tpu.memory_space<vmem>>, %arg3: memref<1x4x200xf32, #tpu.memory_space<vmem>>, %arg4: memref<1x200x200xbf16, #tpu.memory_space<vmem>>, %arg5: memref<1x200x200xbf16, #tpu.memory_space<vmem>>, %arg6: memref<1x200x200xbf16, #tpu.memory_space<vmem>>, %arg7: memref<1x200x5xf32, #tpu.memory_space<vmem>>, %arg8: memref<1x1x5xf32, #tpu.memory_space<vmem>>, %arg9: memref<1x200x5xf32, #tpu.memory_space<vmem>>, %arg10: memref<1x1x5xf32, #tpu.memory_space<vmem>>, %arg11: memref<1x5xf32, #tpu.memory_space<vmem>>, %arg12: memref<1x5xf32, #tpu.memory_space<vmem>>, %arg13: memref<1x8x5xf32, #tpu.memory_space<vmem>>, %arg14: memref<1x8x5xf32, #tpu.memory_space<vmem>>) attributes {dimension_semantics = [#tpu.dimension_semantics<parallel>], iteration_bounds = array<i64: 5>, scalar_prefetch = 0 : i64, scratch_operands = 0 : i64, tpu.core_type = #tpu.core_type<tc>, window_params = [{transform_indices = @transform_0, window_bounds = array<i64: 1, 8, 7>}, {transform_indices = @transform_1, window_bounds = array<i64: 1, 7, 200>}, {transform_indices = @transform_2, window_bounds = array<i64: 1, 4, 200>}, {transform_indices = @transform_3, window_bounds = array<i64: 1, 200, 200>}, {transform_indices = @transform_4, window_bounds = array<i64: 1, 200, 200>}, {transform_indices = @transform_5, window_bounds = array<i64: 1, 200, 200>}, {transform_indices = @transform_6, window_bounds = array<i64: 1, 200, 5>}, {transform_indices = @transform_7, window_bounds = array<i64: 1, 1, 5>}, {transform_indices = @transform_8, window_bounds = array<i64: 1, 200, 5>}, {transform_indices = @transform_9, window_bounds = array<i64: 1, 1, 5>}, {pipeline_mode = #tpu.pipeline_mode<synchronous>, transform_indices = @transform_10, window_bounds = array<i64: 1, 5>}, {pipeline_mode = #tpu.pipeline_mode<synchronous>, transform_indices = @transform_11, window_bounds = array<i64: 1, 5>}, {transform_indices = @transform_12, window_bounds = array<i64: 1, 8, 5>}, {transform_indices = @transform_13, window_bounds = array<i64: 1, 8, 5>}]} {
    %c0 = arith.constant 0 : index
    %c0_0 = arith.constant 0 : index
    %c0_1 = arith.constant 0 : index
    %0 = vector.load %arg1[%c0, %c0_0, %c0_1] : memref<1x8x7xf32, #tpu.memory_space<vmem>>, vector<1x8x7xf32>
    %1 = vector.shape_cast %0 : vector<1x8x7xf32> to vector<8x7xf32>
    %c0_2 = arith.constant 0 : index
    %c0_3 = arith.constant 0 : index
    %c0_4 = arith.constant 0 : index
    %2 = vector.load %arg2[%c0_2, %c0_3, %c0_4] : memref<1x7x200xf32, #tpu.memory_space<vmem>>, vector<1x7x200xf32>
    %3 = vector.shape_cast %2 : vector<1x7x200xf32> to vector<7x200xf32>
    %cst = arith.constant dense<0.000000e+00> : vector<8x200xf32>
    %4 = tpu.matmul %1, %3, %cst {dimension_numbers = #tpu.dot_dimension_numbers<[1], [0], [0], [1], [0, 0, 1, 1], [], []>} : vector<8x7xf32>, vector<7x200xf32>, vector<8x200xf32> -> vector<8x200xf32>
    %c0_5 = arith.constant 0 : index
    %c0_6 = arith.constant 0 : index
    %c0_7 = arith.constant 0 : index
    %5 = vector.load %arg3[%c0_5, %c0_6, %c0_7] : memref<1x4x200xf32, #tpu.memory_space<vmem>>, vector<1x1x200xf32>
    %6 = vector.shape_cast %5 : vector<1x1x200xf32> to vector<1x200xf32>
    %7 = vector.broadcast %6 : vector<1x200xf32> to vector<8x200xf32>
    %8 = arith.addf %4, %7 : vector<8x200xf32>
    %9 = arith.negf %8 : vector<8x200xf32>
    %10 = math.exp %9 : vector<8x200xf32>
    %cst_8 = arith.constant 1.000000e+00 : f32
    %11 = vector.broadcast %cst_8 : f32 to vector<8x200xf32>
    %12 = arith.addf %11, %10 : vector<8x200xf32>
    %13 = arith.divf %11, %12 : vector<8x200xf32>
    %14 = arith.mulf %8, %13 : vector<8x200xf32>
    %c0_9 = arith.constant 0 : index
    %c0_10 = arith.constant 0 : index
    %c0_11 = arith.constant 0 : index
    %15 = vector.load %arg4[%c0_9, %c0_10, %c0_11] : memref<1x200x200xbf16, #tpu.memory_space<vmem>>, vector<1x200x200xbf16>
    %16 = vector.shape_cast %15 : vector<1x200x200xbf16> to vector<200x200xbf16>
    %17 = arith.extf %16 : vector<200x200xbf16> to vector<200x200xf32>
    %cst_12 = arith.constant dense<0.000000e+00> : vector<8x200xf32>
    %18 = tpu.matmul %14, %17, %cst_12 {dimension_numbers = #tpu.dot_dimension_numbers<[1], [0], [0], [1], [0, 0, 1, 1], [], []>} : vector<8x200xf32>, vector<200x200xf32>, vector<8x200xf32> -> vector<8x200xf32>
    %c0_13 = arith.constant 0 : index
    %c1 = arith.constant 1 : index
    %c0_14 = arith.constant 0 : index
    %19 = vector.load %arg3[%c0_13, %c1, %c0_14] : memref<1x4x200xf32, #tpu.memory_space<vmem>>, vector<1x1x200xf32>
    %20 = vector.shape_cast %19 : vector<1x1x200xf32> to vector<1x200xf32>
    %21 = vector.broadcast %20 : vector<1x200xf32> to vector<8x200xf32>
    %22 = arith.addf %18, %21 : vector<8x200xf32>
    %23 = arith.negf %22 : vector<8x200xf32>
    %24 = math.exp %23 : vector<8x200xf32>
    %cst_15 = arith.constant 1.000000e+00 : f32
    %25 = vector.broadcast %cst_15 : f32 to vector<8x200xf32>
    %26 = arith.addf %25, %24 : vector<8x200xf32>
    %27 = arith.divf %25, %26 : vector<8x200xf32>
    %28 = arith.mulf %22, %27 : vector<8x200xf32>
    %c0_16 = arith.constant 0 : index
    %c0_17 = arith.constant 0 : index
    %c0_18 = arith.constant 0 : index
    %29 = vector.load %arg5[%c0_16, %c0_17, %c0_18] : memref<1x200x200xbf16, #tpu.memory_space<vmem>>, vector<1x200x200xbf16>
    %30 = vector.shape_cast %29 : vector<1x200x200xbf16> to vector<200x200xbf16>
    %31 = arith.extf %30 : vector<200x200xbf16> to vector<200x200xf32>
    %cst_19 = arith.constant dense<0.000000e+00> : vector<8x200xf32>
    %32 = tpu.matmul %28, %31, %cst_19 {dimension_numbers = #tpu.dot_dimension_numbers<[1], [0], [0], [1], [0, 0, 1, 1], [], []>} : vector<8x200xf32>, vector<200x200xf32>, vector<8x200xf32> -> vector<8x200xf32>
    %c0_20 = arith.constant 0 : index
    %c2 = arith.constant 2 : index
    %c0_21 = arith.constant 0 : index
    %33 = vector.load %arg3[%c0_20, %c2, %c0_21] : memref<1x4x200xf32, #tpu.memory_space<vmem>>, vector<1x1x200xf32>
    %34 = vector.shape_cast %33 : vector<1x1x200xf32> to vector<1x200xf32>
    %35 = vector.broadcast %34 : vector<1x200xf32> to vector<8x200xf32>
    %36 = arith.addf %32, %35 : vector<8x200xf32>
    %37 = arith.negf %36 : vector<8x200xf32>
    %38 = math.exp %37 : vector<8x200xf32>
    %cst_22 = arith.constant 1.000000e+00 : f32
    %39 = vector.broadcast %cst_22 : f32 to vector<8x200xf32>
    %40 = arith.addf %39, %38 : vector<8x200xf32>
    %41 = arith.divf %39, %40 : vector<8x200xf32>
    %42 = arith.mulf %36, %41 : vector<8x200xf32>
    %c0_23 = arith.constant 0 : index
    %c0_24 = arith.constant 0 : index
    %c0_25 = arith.constant 0 : index
    %43 = vector.load %arg6[%c0_23, %c0_24, %c0_25] : memref<1x200x200xbf16, #tpu.memory_space<vmem>>, vector<1x200x200xbf16>
    %44 = vector.shape_cast %43 : vector<1x200x200xbf16> to vector<200x200xbf16>
    %45 = arith.extf %44 : vector<200x200xbf16> to vector<200x200xf32>
    %cst_26 = arith.constant dense<0.000000e+00> : vector<8x200xf32>
    %46 = tpu.matmul %42, %45, %cst_26 {dimension_numbers = #tpu.dot_dimension_numbers<[1], [0], [0], [1], [0, 0, 1, 1], [], []>} : vector<8x200xf32>, vector<200x200xf32>, vector<8x200xf32> -> vector<8x200xf32>
    %c0_27 = arith.constant 0 : index
    %c3 = arith.constant 3 : index
    %c0_28 = arith.constant 0 : index
    %47 = vector.load %arg3[%c0_27, %c3, %c0_28] : memref<1x4x200xf32, #tpu.memory_space<vmem>>, vector<1x1x200xf32>
    %48 = vector.shape_cast %47 : vector<1x1x200xf32> to vector<1x200xf32>
    %49 = vector.broadcast %48 : vector<1x200xf32> to vector<8x200xf32>
    %50 = arith.addf %46, %49 : vector<8x200xf32>
    %51 = arith.negf %50 : vector<8x200xf32>
    %52 = math.exp %51 : vector<8x200xf32>
    %cst_29 = arith.constant 1.000000e+00 : f32
    %53 = vector.broadcast %cst_29 : f32 to vector<8x200xf32>
    %54 = arith.addf %53, %52 : vector<8x200xf32>
    %55 = arith.divf %53, %54 : vector<8x200xf32>
    %56 = arith.mulf %50, %55 : vector<8x200xf32>
    %c0_30 = arith.constant 0 : index
    %c0_31 = arith.constant 0 : index
    %c0_32 = arith.constant 0 : index
    %57 = vector.load %arg7[%c0_30, %c0_31, %c0_32] : memref<1x200x5xf32, #tpu.memory_space<vmem>>, vector<1x200x5xf32>
    %58 = vector.shape_cast %57 : vector<1x200x5xf32> to vector<200x5xf32>
    %cst_33 = arith.constant dense<0.000000e+00> : vector<8x5xf32>
    %59 = tpu.matmul %56, %58, %cst_33 {dimension_numbers = #tpu.dot_dimension_numbers<[1], [0], [0], [1], [0, 0, 1, 1], [], []>} : vector<8x200xf32>, vector<200x5xf32>, vector<8x5xf32> -> vector<8x5xf32>
    %c0_34 = arith.constant 0 : index
    %c0_35 = arith.constant 0 : index
    %c0_36 = arith.constant 0 : index
    %60 = vector.load %arg8[%c0_34, %c0_35, %c0_36] : memref<1x1x5xf32, #tpu.memory_space<vmem>>, vector<1x1x5xf32>
    %61 = vector.shape_cast %60 : vector<1x1x5xf32> to vector<1x5xf32>
    %62 = vector.broadcast %61 : vector<1x5xf32> to vector<8x5xf32>
    %63 = arith.addf %59, %62 : vector<8x5xf32>
    %c0_37 = arith.constant 0 : index
    %c0_38 = arith.constant 0 : index
    %c0_39 = arith.constant 0 : index
    %64 = vector.load %arg9[%c0_37, %c0_38, %c0_39] : memref<1x200x5xf32, #tpu.memory_space<vmem>>, vector<1x200x5xf32>
    %65 = vector.shape_cast %64 : vector<1x200x5xf32> to vector<200x5xf32>
    %cst_40 = arith.constant dense<0.000000e+00> : vector<8x5xf32>
    %66 = tpu.matmul %56, %65, %cst_40 {dimension_numbers = #tpu.dot_dimension_numbers<[1], [0], [0], [1], [0, 0, 1, 1], [], []>} : vector<8x200xf32>, vector<200x5xf32>, vector<8x5xf32> -> vector<8x5xf32>
    %c0_41 = arith.constant 0 : index
    %c0_42 = arith.constant 0 : index
    %c0_43 = arith.constant 0 : index
    %67 = vector.load %arg10[%c0_41, %c0_42, %c0_43] : memref<1x1x5xf32, #tpu.memory_space<vmem>>, vector<1x1x5xf32>
    %68 = vector.shape_cast %67 : vector<1x1x5xf32> to vector<1x5xf32>
    %69 = vector.broadcast %68 : vector<1x5xf32> to vector<8x5xf32>
    %70 = arith.addf %66, %69 : vector<8x5xf32>
    %c0_44 = arith.constant 0 : index
    %c0_45 = arith.constant 0 : index
    %71 = vector.load %arg11[%c0_44, %c0_45] : memref<1x5xf32, #tpu.memory_space<vmem>>, vector<1x5xf32>
    %c0_46 = arith.constant 0 : index
    %c0_47 = arith.constant 0 : index
    %72 = vector.load %arg12[%c0_46, %c0_47] : memref<1x5xf32, #tpu.memory_space<vmem>>, vector<1x5xf32>
    %73 = vector.broadcast %71 : vector<1x5xf32> to vector<8x5xf32>
    %74 = arith.subf %73, %70 : vector<8x5xf32>
    %cst_48 = arith.constant 0.000000e+00 : f32
    %75 = vector.broadcast %cst_48 : f32 to vector<8x5xf32>
    %76 = arith.maximumf %74, %75 : vector<8x5xf32>
    %77 = vector.broadcast %cst_48 : f32 to vector<8x5xf32>
    %78 = arith.subf %74, %77 : vector<8x5xf32>
    %79 = arith.cmpf one, %78, %78 : vector<8x5xf32>
    %80 = vector.broadcast %cst_48 : f32 to vector<8x5xf32>
    %81 = arith.addf %74, %80 : vector<8x5xf32>
    %82 = math.absf %78 : vector<8x5xf32>
    %cst_49 = arith.constant 0.000000e+00 : f32
    %83 = vector.broadcast %cst_49 : f32 to vector<8x5xf32>
    %84 = arith.subf %83, %82 : vector<8x5xf32>
    %85 = math.exp %84 : vector<8x5xf32>
    %86 = math.log1p %85 : vector<8x5xf32>
    %87 = arith.addf %76, %86 : vector<8x5xf32>
    %88 = arith.select %79, %81, %87 : vector<8x5xi1>, vector<8x5xf32>
    %89 = vector.broadcast %71 : vector<1x5xf32> to vector<8x5xf32>
    %90 = arith.subf %89, %88 : vector<8x5xf32>
    %91 = vector.broadcast %72 : vector<1x5xf32> to vector<8x5xf32>
    %92 = arith.subf %90, %91 : vector<8x5xf32>
    %cst_50 = arith.constant 0.000000e+00 : f32
    %93 = vector.broadcast %cst_50 : f32 to vector<8x5xf32>
    %94 = arith.maximumf %92, %93 : vector<8x5xf32>
    %95 = vector.broadcast %cst_50 : f32 to vector<8x5xf32>
    %96 = arith.subf %92, %95 : vector<8x5xf32>
    %97 = arith.cmpf one, %96, %96 : vector<8x5xf32>
    %98 = vector.broadcast %cst_50 : f32 to vector<8x5xf32>
    %99 = arith.addf %92, %98 : vector<8x5xf32>
    %100 = math.absf %96 : vector<8x5xf32>
    %cst_51 = arith.constant 0.000000e+00 : f32
    %101 = vector.broadcast %cst_51 : f32 to vector<8x5xf32>
    %102 = arith.subf %101, %100 : vector<8x5xf32>
    %103 = math.exp %102 : vector<8x5xf32>
    %104 = math.log1p %103 : vector<8x5xf32>
    %105 = arith.addf %94, %104 : vector<8x5xf32>
    %106 = arith.select %97, %99, %105 : vector<8x5xi1>, vector<8x5xf32>
    %107 = vector.broadcast %72 : vector<1x5xf32> to vector<8x5xf32>
    %108 = arith.addf %107, %106 : vector<8x5xf32>
    %c0_52 = arith.constant 0 : index
    %c0_53 = arith.constant 0 : index
    %c0_54 = arith.constant 0 : index
    %109 = vector.load %arg13[%c0_52, %c0_53, %c0_54] : memref<1x8x5xf32, #tpu.memory_space<vmem>>, vector<1x8x5xf32>
    %110 = vector.shape_cast %109 : vector<1x8x5xf32> to vector<8x5xf32>
    %111 = vector.shape_cast %63 : vector<8x5xf32> to vector<1x8x5xf32>
    tpu.vector_store %arg13[%c0_52, %c0_53, %c0_54], %111 {strides = array<i32>} : memref<1x8x5xf32, #tpu.memory_space<vmem>>, vector<1x8x5xf32>,
    %112 = math.exp %108 : vector<8x5xf32>
    %c0_55 = arith.constant 0 : index
    %c0_56 = arith.constant 0 : index
    %c0_57 = arith.constant 0 : index
    %113 = vector.load %arg14[%c0_55, %c0_56, %c0_57] : memref<1x8x5xf32, #tpu.memory_space<vmem>>, vector<1x8x5xf32>
    %114 = vector.shape_cast %113 : vector<1x8x5xf32> to vector<8x5xf32>
    %115 = vector.shape_cast %112 : vector<8x5xf32> to vector<1x8x5xf32>
    tpu.vector_store %arg14[%c0_55, %c0_56, %c0_57], %115 {strides = array<i32>} : memref<1x8x5xf32, #tpu.memory_space<vmem>>, vector<1x8x5xf32>,
    return
  }
  func.func @transform_0(%arg0: i32) -> (i32, i32, i32) {
    %c0_i32 = arith.constant 0 : i32
    %c0_i32_0 = arith.constant 0 : i32
    %c0_i32_1 = arith.constant 0 : i32
    return %arg0, %c0_i32, %c0_i32_0 : i32, i32, i32
  }
  func.func @transform_1(%arg0: i32) -> (i32, i32, i32) {
    %c0_i32 = arith.constant 0 : i32
    %c0_i32_0 = arith.constant 0 : i32
    %c0_i32_1 = arith.constant 0 : i32
    return %arg0, %c0_i32, %c0_i32_0 : i32, i32, i32
  }
  func.func @transform_2(%arg0: i32) -> (i32, i32, i32) {
    %c0_i32 = arith.constant 0 : i32
    %c0_i32_0 = arith.constant 0 : i32
    %c0_i32_1 = arith.constant 0 : i32
    return %arg0, %c0_i32, %c0_i32_0 : i32, i32, i32
  }
  func.func @transform_3(%arg0: i32) -> (i32, i32, i32) {
    %c0_i32 = arith.constant 0 : i32
    %c0_i32_0 = arith.constant 0 : i32
    %c0_i32_1 = arith.constant 0 : i32
    return %arg0, %c0_i32, %c0_i32_0 : i32, i32, i32
  }
  func.func @transform_4(%arg0: i32) -> (i32, i32, i32) {
    %c0_i32 = arith.constant 0 : i32
    %c0_i32_0 = arith.constant 0 : i32
    %c0_i32_1 = arith.constant 0 : i32
    return %arg0, %c0_i32, %c0_i32_0 : i32, i32, i32
  }
  func.func @transform_5(%arg0: i32) -> (i32, i32, i32) {
    %c0_i32 = arith.constant 0 : i32
    %c0_i32_0 = arith.constant 0 : i32
    %c0_i32_1 = arith.constant 0 : i32
    return %arg0, %c0_i32, %c0_i32_0 : i32, i32, i32
  }
  func.func @transform_6(%arg0: i32) -> (i32, i32, i32) {
    %c0_i32 = arith.constant 0 : i32
    %c0_i32_0 = arith.constant 0 : i32
    %c0_i32_1 = arith.constant 0 : i32
    return %arg0, %c0_i32, %c0_i32_0 : i32, i32, i32
  }
  func.func @transform_7(%arg0: i32) -> (i32, i32, i32) {
    %c0_i32 = arith.constant 0 : i32
    %c0_i32_0 = arith.constant 0 : i32
    %c0_i32_1 = arith.constant 0 : i32
    return %arg0, %c0_i32, %c0_i32_0 : i32, i32, i32
  }
  func.func @transform_8(%arg0: i32) -> (i32, i32, i32) {
    %c0_i32 = arith.constant 0 : i32
    %c0_i32_0 = arith.constant 0 : i32
    %c0_i32_1 = arith.constant 0 : i32
    return %arg0, %c0_i32, %c0_i32_0 : i32, i32, i32
  }
  func.func @transform_9(%arg0: i32) -> (i32, i32, i32) {
    %c0_i32 = arith.constant 0 : i32
    %c0_i32_0 = arith.constant 0 : i32
    %c0_i32_1 = arith.constant 0 : i32
    return %arg0, %c0_i32, %c0_i32_0 : i32, i32, i32
  }
  func.func @transform_10(%arg0: i32) -> (i32, i32) {
    %c0_i32 = arith.constant 0 : i32
    %c0_i32_0 = arith.constant 0 : i32
    %c0_i32_1 = arith.constant 0 : i32
    return %c0_i32, %c0_i32_0 : i32, i32
  }
  func.func @transform_11(%arg0: i32) -> (i32, i32) {
    %c0_i32 = arith.constant 0 : i32
    %c0_i32_0 = arith.constant 0 : i32
    %c0_i32_1 = arith.constant 0 : i32
    return %c0_i32, %c0_i32_0 : i32, i32
  }
  func.func @transform_12(%arg0: i32) -> (i32, i32, i32) {
    %c0_i32 = arith.constant 0 : i32
    %c0_i32_0 = arith.constant 0 : i32
    %c0_i32_1 = arith.constant 0 : i32
    return %arg0, %c0_i32, %c0_i32_0 : i32, i32, i32
  }
  func.func @transform_13(%arg0: i32) -> (i32, i32, i32) {
    %c0_i32 = arith.constant 0 : i32
    %c0_i32_0 = arith.constant 0 : i32
    %c0_i32_1 = arith.constant 0 : i32
    return %arg0, %c0_i32, %c0_i32_0 : i32, i32, i32
  }
}

</mosaic_0001>

<bundles_post_ra>
// kernel: ensemble_forward.1
= control target key start
LH: loop header
LB: loop body
LE: loop exit
PB: predicated region body
PF: predicated region fallthrough
CT: control target
= control target key end

     0   :  { %s3001_s0 = inlined_call_operand.hbm [shape: f32[5,8,7], index: 0, kind: input, shape index: {}]   ;;  %s3002_s1 = inlined_call_operand.vmem [shape: f32[5,7,200], index: 1, kind: input, shape index: {}]   ;;  %s3003_s2 = inlined_call_operand.hbm [shape: f32[5,4,200], index: 2, kind: input, shape index: {}]   ;;  %s3004_s3 = inlined_call_operand.vmem [shape: bf16[5,200,200], index: 3, kind: input, shape index: {}]   ;;  %s3005_s4 = inlined_call_operand.vmem [shape: bf16[5,200,200], index: 4, kind: input, shape index: {}]   ;;  %s3006_s5 = inlined_call_operand.hbm [shape: bf16[5,200,200], index: 5, kind: input, shape index: {}]   ;;  %s3007_s6 = inlined_call_operand.vmem [shape: f32[5,200,5], index: 6, kind: input, shape index: {}]   ;;  %s3008_s7 = inlined_call_operand.hbm [shape: f32[5,1,5], index: 7, kind: input, shape index: {}]   ;;  %s3009_s8 = inlined_call_operand.vmem [shape: f32[5,200,5], index: 8, kind: input, shape index: {}]   ;;  %s3010_s9 = inlined_call_operand.hbm [shape: f32[5,1,5], index: 9, kind: input, shape index: {}]   ;;  %s3011_s10 = inlined_call_operand.hbm [shape: f32[1,5], index: 10, kind: input, shape index: {}]   ;;  %s3012_s11 = inlined_call_operand.hbm [shape: f32[1,5], index: 11, kind: input, shape index: {}]   ;;  %s3013_s12 = inlined_call_operand.hbm [shape: f32[5,8,5], index: 12, kind: output, shape index: {0}]   ;;  %s3014_s13 = inlined_call_operand.hbm [shape: f32[5,8,5], index: 13, kind: output, shape index: {1}]  }
   0x1   :  { %3027 = sst [smem:[#allocation29_spill]] %s3001_s0 }
   0x2   :  { %3028 = sst [smem:[#allocation30_spill]] %s3003_s2 }
   0x3   :  { %3029 = sst [smem:[#allocation31_spill]] %s3004_s3 }
   0x4   :  { %3030 = sst [smem:[#allocation32_spill]] %s3005_s4 }
   0x5   :  { %3031 = sst [smem:[#allocation33_spill]] %s3007_s6 }
   0x6   :  { %3032 = sst [smem:[#allocation34_spill]] %s3009_s8 }
   0x7   :  { %3033 = sst [smem:[#allocation35_spill]] %s3011_s10 }
   0x8   :  { %3034 = sst [smem:[#allocation36_spill]] %s3013_s12 }
   0x9   :  { %3035 = sst [smem:[#allocation37_spill]] %s3014_s13 }
   0xa   :  { %19 = vsyncpa [#allocation3], 0 }
   0xb   :  { %21 = vsyncpa [#allocation3 + $0x1], 0 }
   0xc   :  { %22 = vsyncpa [#allocation6], 0 }
   0xd   :  { %24 = vsyncpa [#allocation6 + $0x1], 0 }
   0xe   :  { %25 = vsyncpa [#allocation9], 0 }
   0xf   :  { %27 = vsyncpa [#allocation9 + $0x1], 0 }
  0x10   :  { %28 = vsyncpa [#allocation12], 0 }
  0x11   :  { %29 = vsyncpa [#allocation4], 0 }
  0x12   :  { %31 = vsyncpa [#allocation4 + $0x1], 0 }
  0x13   :  { %32 = vsyncpa [#allocation16], 0 }
  0x14   :  { %34 = vsyncpa [#allocation16 + $0x1], 0  ;;  %s2544_s25 = smov 0   ;;  %s2546_s26 = smov 0  }
  0x15   :  { %s2548_s27 = smov 0   ;;  %s2550_s28 = smov 0  }
  0x16 LB: > { %3036 = sst [smem:[#allocation23_spill]] %s2456_s25  ;;  %s2565_s29 = sadd.s32 4294967295, %s2468_s28   ;;  %s2468_s28 = sphi %s2550_s28, %s3066_s28   ;;  %s2464_s27 = sphi %s2548_s27, %s3068_s27   ;;  %s2460_s26 = sphi %s2546_s26, %s3070_s26   ;;  %s2456_s25 = sphi %s2544_s25, %s3069_s25  }
  0x17   : > { %3037 = sst [smem:[#allocation24_spill]] %s2464_s27  ;;  %s1949_s30 = sadd.s32 4294967294, %s2468_s28  }
  0x18   : > { %s2569_s14 = sadd.s32 1, %s2468_s28   ;;  %s47_s15 = sadd.s32 1, %s2464_s27 }
  0x19   : > { %3038 = sst [smem:[#allocation25_spill]] %s2569_s14  ;;  %s44_s16 = ssub.s32 %s2468_s28, %s2569_s14 }
  0x1a   : > { %p54_p0 = scmp.ne.s32.totalorder %s2464_s27, %s2460_s26  ;;  %p45_p1 = scmp.eq.s32.totalorder %s44_s16, 0 }
  0x1b   : > { %p55_p2 = scmp.eq.s32.totalorder %s2468_s28, 0  ;;  %p60_p3 = scmp.ne.s32.totalorder %s2460_s26, %s2456_s25 }
  0x1c   : > { %p3025_p4 = scmp.eq.s32.totalorder %s2565_s29, 0  ;;  %p360_p7 = scmp.eq.s32.totalorder %s2565_s29, 4 }
  0x1d   : > { %s2581_s17 = scalar_select %p45_p1, %s2464_s27, %s47_s15  }
  0x1e   : > { %p2583_p5 = por %p55_p2, %p54_p0  ;;  %p2589_p6 = por %p3025_p4, %p60_p3 }
  0x1f   : > { %3039 = sst [smem:[#allocation26_spill]] %s2581_s17  ;;  %p366_p8 = scmp.eq.s32.totalorder %s1949_s30, 4 }
  0x20   : > { %p1950_p9 = scmp.ge.s32.totalorder %s2468_s28, 1  ;;  %p399_p10 = scmp.lt.s32.totalorder %s2468_s28, 6 }
  0x21   : > { %p2596_p11 = por %p360_p7, %p54_p0  ;;  %p2600_p12 = por %p366_p8, %p60_p3 }
  0x22   : > { %p2604_p13 = pnand %p1950_p9, %p399_p10  ;;  %s3047_s10 = sld [smem:[#allocation35_spill]] }
  0x23   : > { %s3042_s20 = scalar_select %p2596_p11, 1, 0 }
  0x24   : > { %s3044_s21 = scalar_select %p2600_p12, 1, 0 }
  0x25   : > { %3043 = sst [smem:[#allocation27_spill]] %s3042_s20  ;;  %p2030_p0 = pneg %p2604_p13 }
  0x26   : > { %3045 = sst [smem:[#allocation28_spill]] %s3044_s21  ;;  %s2470_s15 = smov [#allocation11]  }
  0x27   : > { %s413_s16 = sshll.u32 %s2470_s15, 4  ;;  %p2615_p1 = pnand %p2030_p0, %p3025_p4  ;;  %s414_s16 = int_to_ptr.vmem [resolvable:$true] %s413_s16 }
  0x28   : > { %s411_s30 = sshll.u32 %s3047_s10, 4  ;;  %p2062_p2 = scmp.lt.s32.totalorder %s2468_s28, 5  ;;  %s412_s30 = int_to_ptr.hbm [resolvable:$true] %s411_s30 }
  0x29   : > { %s2621_s14 = sand.u32 1, %s2464_s27   ;;  %s3026_s15 = sshll.u32 %s2468_s28, 3 }
  0x2a   : > { %s3024_s23 = sshll.u32 %s2621_s14, 3  ;;  %p2628_p3 = pnand %p2062_p2, %p2583_p5 }
  0x2b   : > { %2033 = dma.hbm_to_vmem [thread:$0]  (!%p2615_p1), %s412_s30, 16, %s414_s16, [#allocation12]  }
  0x2c   : > { %s463_s10 = sand.u32 1, %s2468_s28   ;;  %s3050_s2 = sld [smem:[#allocation30_spill]] }
  0x2d   : > { %s467_s27 = scalar_lea.vmem [#allocation5], %s3024_s23  ;;  %s2641_s30 = scalar_lea.sflag [#allocation6], %s463_s10 }
  0x2e   : > { %s476_s20 = sshll.u32 %s467_s27, 4  ;;  %p2645_p7 = pneg %p2628_p3  ;;  %s477_s20 = int_to_ptr.vmem [resolvable:$true] %s476_s20 }
  0x32   : > { %s472_s13 = scalar_lea.hbm %s3050_s2, %s3026_s15 }
  0x33   : > { %s474_s12 = sshll.u32 %s472_s13, 4  ;;  %s2185_s13 = scalar_lea.hbm %s3050_s2, 40  ;;  %s475_s12 = int_to_ptr.hbm [resolvable:$true] %s474_s12 }
  0x34   : > { %s2178_s18 = sshra.s32 %s475_s12, 4  ;;  %s2179_s18 = int_to_ptr.hbm [resolvable:$true] %s2178_s18 }
  0x35   : > { %s2180_s16 = scalar_lea.hbm %s2179_s18, 8  ;;  %p2186_p10 = scmp.lt.s32.totalorder %s2179_s18, %s3050_s2 }
  0x36   : > { %p2181_p5 = scmp.ne.s32.totalorder %s2179_s18, %s2180_s16  ;;  %p2187_p0 = scmp.lt.s32.totalorder %s2185_s13, %s2180_s16 }
  0x38   : > { %p2183_p8 = pnand %p2645_p7, %p2181_p5  ;;  %p2188_p2 = por %p2187_p0, %p2186_p10 }
  0x3a   : > { %p2184_p9 = pneg %p2183_p8 }
  0x3c   : > { %p2189_p4 = pnand %p2188_p2, %p2184_p9 }
  0x3e   : > { %2192 = shalt.err (!%p2189_p4)
}
  0x3f   : > { %2043 = dma.hbm_to_vmem [thread:$0]  (!%p2628_p3), %s475_s12, 128, %s477_s20, %s2641_s30  }
  0x40   : > { %s535_s25 = scalar_lea.hbm %s3008_s7, %s2468_s28  ;;  %s532_s4 = scalar_lea.vmem [#allocation8], %s2621_s14 }
  0x41   : > { %s537_s27 = sshll.u32 %s535_s25, 4  ;;  %s539_s3 = sshll.u32 %s532_s4, 4  ;;  %s538_s27 = int_to_ptr.hbm [resolvable:$true] %s537_s27  ;;  %s540_s3 = int_to_ptr.vmem [resolvable:$true] %s539_s3 }
  0x42   : > { %s2665_s23 = scalar_lea.sflag [#allocation9], %s463_s10  ;;  %s2208_s18 = sshra.s32 %s538_s27, 4  ;;  %s2209_s18 = int_to_ptr.hbm [resolvable:$true] %s2208_s18 }
  0x43   : > { %s2210_s16 = scalar_lea.hbm %s2209_s18, 1  ;;  %s2215_s20 = scalar_lea.hbm %s3008_s7, 5 }
  0x44   : > { %p2211_p4 = scmp.ne.s32.totalorder %s2209_s18, %s2210_s16  ;;  %p2216_p9 = scmp.lt.s32.totalorder %s2209_s18, %s3008_s7 }
  0x45   : > { %p2217_p10 = scmp.lt.s32.totalorder %s2215_s20, %s2210_s16 }
  0x46   : > { %p2213_p5 = pnand %p2211_p4, %p2645_p7 }
  0x47   : > { %p2218_p0 = por %p2217_p10, %p2216_p9 }
  0x48   : > { %p2214_p8 = pneg %p2213_p5 }
  0x4a   : > { %p2219_p2 = pnand %p2218_p0, %p2214_p8 }
  0x4c   : > { %2222 = shalt.err (!%p2219_p2)
}
  0x4d   : > { %2049 = dma.hbm_to_vmem [thread:$0]  (!%p2628_p3), %s538_s27, 16, %s540_s3, %s2665_s23  }
  0x4e   : > { %s423_s21 = sshll.u32 %s3012_s11, 4  ;;  %s2471_s25 = smov [#allocation13]   ;;  %s424_s21 = int_to_ptr.hbm [resolvable:$true] %s423_s21 }
  0x4f   : > { %s425_s18 = sshll.u32 %s2471_s25, 4  ;;  %s3052_s16 = sshll.u32 %s2468_s28, 3  ;;  %s426_s18 = int_to_ptr.vmem [resolvable:$true] %s425_s18 }
  0x50   : > { %2036 = dma.hbm_to_vmem [thread:$0]  (!%p2615_p1), %s424_s21, 16, %s426_s18, [#allocation12]  }
  0x51   : > { %s3053_s0 = sld [smem:[#allocation29_spill]]  ;;  %s3054_s15 = sshll.u32 %s2621_s14, 3 }
  0x52   : > { %s440_s2 = scalar_lea.vmem [#allocation2], %s3054_s15  ;;  %s437_s27 = scalar_lea.sflag [#allocation3], %s2621_s14 }
  0x53   : > { %s448_s3 = sshll.u32 %s440_s2, 4  ;;  %s449_s3 = int_to_ptr.vmem [resolvable:$true] %s448_s3 }
  0x57   : > { %s444_s20 = scalar_lea.hbm %s3053_s0, %s3052_s16  ;;  %s2275_s25 = scalar_lea.hbm %s3053_s0, 40 }
  0x58   : > { %s446_s6 = sshll.u32 %s444_s20, 4  ;;  %s447_s6 = int_to_ptr.hbm [resolvable:$true] %s446_s6 }
  0x59   : > { %s2268_s4 = sshra.s32 %s447_s6, 4  ;;  %s2269_s4 = int_to_ptr.hbm [resolvable:$true] %s2268_s4 }
  0x5a   : > { %s2270_s10 = scalar_lea.hbm %s2269_s4, 8  ;;  %p2276_p1 = scmp.lt.s32.totalorder %s2269_s4, %s3053_s0 }
  0x5b   : > { %p2271_p4 = scmp.ne.s32.totalorder %s2269_s4, %s2270_s10  ;;  %p2277_p9 = scmp.lt.s32.totalorder %s2275_s25, %s2270_s10 }
  0x5d   : > { %p2273_p5 = pnand %p2271_p4, %p2645_p7  ;;  %p2278_p10 = por %p2277_p9, %p2276_p1 }
  0x5f   : > { %p2274_p8 = pneg %p2273_p5 }
  0x61   : > { %p2279_p0 = pnand %p2278_p10, %p2274_p8 }
  0x63   : > { %2282 = shalt.err (!%p2279_p0)
}
  0x64   : > { %2040 = dma.hbm_to_vmem [thread:$0]  (!%p2628_p3), %s447_s6, 128, %s449_s3, %s437_s27  }
  0x65   : > { %s2004_s2 = smul.u32 200, %s2621_s14  ;;  %s560_s18 = scalar_lea.hbm %s3010_s9, %s2468_s28 }
  0x66   : > { %s2005_s13 = smul.u32 200, %s2468_s28  ;;  %s2305_s27 = scalar_lea.hbm %s3006_s5, 1000 }
  0x67   : > { %s503_s17 = scalar_lea.vmem [#allocation7], %s2004_s2 }
  0x68   : > { %s508_s15 = scalar_lea.hbm %s3006_s5, %s2005_s13  ;;  %s511_s21 = sshll.u32 %s503_s17, 4  ;;  %s512_s21 = int_to_ptr.vmem [resolvable:$true] %s511_s21 }
  0x69   : > { %s509_s4 = sshll.u32 %s508_s15, 4  ;;  %s510_s4 = int_to_ptr.hbm [resolvable:$true] %s509_s4 }
  0x6a   : > { %s2298_s16 = sshra.s32 %s510_s4, 4  ;;  %s2299_s16 = int_to_ptr.hbm [resolvable:$true] %s2298_s16 }
  0x6b   : > { %s2300_s0 = scalar_lea.hbm %s2299_s16, 200  ;;  %p2306_p8 = scmp.lt.s32.totalorder %s2299_s16, %s3006_s5 }
  0x6c   : > { %p2301_p2 = scmp.ne.s32.totalorder %s2299_s16, %s2300_s0  ;;  %p2307_p1 = scmp.lt.s32.totalorder %s2305_s27, %s2300_s0 }
  0x6e   : > { %p2303_p4 = pnand %p2301_p2, %p2645_p7  ;;  %p2308_p9 = por %p2307_p1, %p2306_p8 }
  0x70   : > { %p2304_p5 = pneg %p2303_p4 }
  0x72   : > { %p2309_p10 = pnand %p2308_p9, %p2304_p5 }
  0x74   : > { %2312 = shalt.err (!%p2309_p10)
}
  0x75   : > { %s2472_s12 = smov 128   ;;  %s2473_s20 = smov 8  }
  0x76   : > { %2046 = dma.hbm_to_vmem [thread:$0]  (!%p2628_p3), %s510_s4, 3200, %s512_s21, %s2641_s30, %s2472_s12, %s2472_s12, %s2473_s20  }
  0x77   : > { %s562_s15 = sshll.u32 %s560_s18, 4  ;;  %s557_s17 = scalar_lea.vmem [#allocation10], %s2621_s14  ;;  %s563_s15 = int_to_ptr.hbm [resolvable:$true] %s562_s15 }
  0x78   : > { %s564_s10 = sshll.u32 %s557_s17, 4  ;;  %s2328_s25 = sshra.s32 %s563_s15, 4  ;;  %s565_s10 = int_to_ptr.vmem [resolvable:$true] %s564_s10  ;;  %s2329_s25 = int_to_ptr.hbm [resolvable:$true] %s2328_s25 }
  0x79   : > { %s2330_s16 = scalar_lea.hbm %s2329_s25, 1  ;;  %s2335_s3 = scalar_lea.hbm %s3010_s9, 5 }
  0x7a   : > { %p2331_p0 = scmp.ne.s32.totalorder %s2329_s25, %s2330_s16  ;;  %p2336_p5 = scmp.lt.s32.totalorder %s2329_s25, %s3010_s9 }
  0x7b   : > { %p2337_p8 = scmp.lt.s32.totalorder %s2335_s3, %s2330_s16 }
  0x7c   : > { %p2333_p2 = pnand %p2331_p0, %p2645_p7 }
  0x7d   : > { %p2338_p1 = por %p2337_p8, %p2336_p5 }
  0x7e   : > { %p2334_p4 = pneg %p2333_p2 }
  0x80   : > { %p2339_p9 = pnand %p2338_p1, %p2334_p4 }
  0x82   : > { %2342 = shalt.err (!%p2339_p9)
}
  0x83   : > { %2052 = dma.hbm_to_vmem [thread:$0]  (!%p2628_p3), %s563_s15, 16, %s565_s10, %s2665_s23  }
  0x84   : > { %573 = sbr.rel (%p2604_p13) target bundleno = 1027 (0x403), region = 68  ;;  %s2736_s8 = sand.u32 (!%p2604_p13), 1, %s2460_s26  }
  0x85   : > { %s2739_s14 = sshll.u32 (!%p2604_p13), %s2736_s8, 3  ;;  %s576_s30 = scalar_lea.sflag (!%p2604_p13), [#allocation3], %s2736_s8 }
  0x86   : > { %s579_s21 = scalar_lea.vmem (!%p2604_p13), [#allocation2], %s2739_s14 }
  0x89   : > { %2431 = dma.done.wait (%p2589_p6), %s576_s30, 128  }
  0x8a   : > { %2433 = vsyncadd (%p2589_p6), %s576_s30, 4294967168  ;;  %s585_s22 = sand.u32 1, %s2565_s29   ;;  %s2749_s23 = scalar_lea.vmem [#allocation5], %s2739_s14 }
  0x8b   : > { %s586_s24 = scalar_lea.sflag [#allocation6], %s585_s22 }
  0x8c   : > { %2435 = dma.done.wait (%p2589_p6), %s586_s24, 3328  }
  0x8d   : > { %2437 = vsyncadd (%p2589_p6), %s586_s24, 4294963968  ;;  %s2006_s4 = smul.u32 200, %s2736_s8  ;;  %s606_s13 = scalar_lea.sflag [#allocation9], %s585_s22 }
  0x8e   : > { %s608_s12 = scalar_lea.vmem [#allocation8], %s2736_s8 }
  0x8f   : > { %s2756_s18 = scalar_lea.vmem [#allocation7], %s2006_s4 }
  0x90   : > { %2439 = dma.done.wait (%p2589_p6), %s606_s13, 32  }
  0x91   : > { %2441 = vsyncadd (%p2589_p6), %s606_s13, 4294967264  ;;  %s617_s20 = scalar_lea.vmem [#allocation10], %s2736_s8  ;;  %p3055_p13 = scmp.eq.s32.totalorder %s2565_s29, 0 }
  0x93   : > { %2443 = dma.done.wait (%p3055_p13), [#allocation12], 32   ;;  %p3056_p3 = pmov %p3055_p13 }
  0x94   : > { %p719_p7 = scmp.lt.s32.totalorder %s2565_s29, 4  ;;  %vm757_vm0 = vcmask 1046528   ;;  %vm753_vm1 = vcmask 56320   ;;  %v744_v2 = vld [vmem:[%s579_s21] sm:$0xff]  ;;  %s3057_s3 = sld [smem:[#allocation31_spill]]  ;;  %vm926_vm10 = vcmask 588800  }
  0x95   : > { %2445 = vsyncadd (%p3056_p3), [#allocation12], 4294967264  ;;  %v747_v53 = vld [vmem:[%s2749_s23] ss:$4 sm:$0x3]  ;;  %s3058_s21 = sld [smem:[#allocation32_spill]] }
  0x96   : > { %s720_s15 = scalar_select %p719_p7, %s2565_s29, 4 }
  0x97   : > { %s3060_s10 = sld [smem:[#allocation34_spill]] }
  0x98   : > { %s2003_s17 = sshll.u32 %s720_s15, 4  ;;  %s2773_s19 = smul.u32 200, %s720_s15 }
  0x99   : > { %s723_s16 = scalar_lea.vmem %s3002_s1, %s2003_s17  ;;  %s3061_s0 = sld [smem:[#allocation36_spill]] }
  0x9a   : > { %v745_v0 = vld [vmem:[%s723_s16] sm:$0x7f]  ;;  %v746_v1 = vld [vmem:[%s723_s16 + $0x8] sm:$0x7f]  ;;  %s2779_s27 = scalar_lea.vmem %s3057_s3, %s2773_s19  ;;  %s711_s3 = scalar_lea.vmem [#allocation14], %s2739_s14 }
  0x9b   : > { %1973 = vmatpush.msk.msra.mxu0 %vm757_vm0, %v745_v0  ;;  %1975 = vmatpush.msk.msra.mxu2 %vm757_vm0, %v746_v1  ;;  %v859_v3 = vld [vmem:[%s2779_s27 + $0x78] sm:$0xff]  ;;  %v858_v6 = vld [vmem:[%s2779_s27 + $0x70] sm:$0xff]  ;;  %v857_v9 = vld [vmem:[%s2779_s27 + $0x68] sm:$0xff]  ;;  %v749_v0 = vperm.slane %v747_v53, 0  ;;  %s2813_s22 = scalar_lea.vmem %s3058_s21, %s2773_s19 }
  0x9c   : > { %1974 = vmatmul.msk.f32.vlgmr.msra.gmra.mxu0 %vm753_vm1, %v744_v2  ;;  %1976 = vmatmul.msk.f32.vlgmr.msra.gmra.mxu2 %vm753_vm1, %v744_v2  ;;  %v899_v4 = vunpack.c.l.bf16 %v859_v3  ;;  %v900_v5 = vunpack.c.h.bf16 %v859_v3  ;;  %v897_v7 = vunpack.c.l.bf16 %v858_v6  ;;  %v898_v8 = vunpack.c.h.bf16 %v858_v6  ;;  %v856_v12 = vld [vmem:[%s2779_s27 + $0x60] sm:$0xff]  ;;  %v855_v15 = vld [vmem:[%s2779_s27 + $0x58] sm:$0xff]  ;;  %v854_v18 = vld [vmem:[%s2779_s27 + $0x50] sm:$0xff] }
  0x9d   : > { %v895_v10 = vunpack.c.l.bf16 %v857_v9  ;;  %v896_v11 = vunpack.c.h.bf16 %v857_v9  ;;  %v893_v13 = vunpack.c.l.bf16 %v856_v12  ;;  %v894_v14 = vunpack.c.h.bf16 %v856_v12  ;;  %v853_v21 = vld [vmem:[%s2779_s27 + $0x48] sm:$0xff]  ;;  %v852_v24 = vld [vmem:[%s2779_s27 + $0x40] sm:$0xff]  ;;  %v851_v27 = vld [vmem:[%s2779_s27 + $0x38] sm:$0xff]  ;;  %s2885_s25 = scalar_lea.vmem %s3060_s10, %s2773_s19 }
  0x9e   : > { %930 = vmatpush.msrb.mxu2 %v899_v4  ;;  %970 = vmatpush.msrb.mxu0 %v900_v5  ;;  %v891_v16 = vunpack.c.l.bf16 %v855_v15  ;;  %v892_v17 = vunpack.c.h.bf16 %v855_v15  ;;  %v889_v19 = vunpack.c.l.bf16 %v854_v18  ;;  %v890_v20 = vunpack.c.h.bf16 %v854_v18  ;;  %v850_v30 = vld [vmem:[%s2779_s27 + $0x30] sm:$0xff]  ;;  %v849_v33 = vld [vmem:[%s2779_s27 + $0x28] sm:$0xff]  ;;  %v868_v34 = vld [vmem:[%s2779_s27 + $0xc0] sm:$0xff] }
  0x9f   : > { %v887_v22 = vunpack.c.l.bf16 %v853_v21  ;;  %v888_v23 = vunpack.c.h.bf16 %v853_v21  ;;  %v885_v25 = vunpack.c.l.bf16 %v852_v24  ;;  %v886_v26 = vunpack.c.h.bf16 %v852_v24  ;;  %v848_v39 = vld [vmem:[%s2779_s27 + $0x20] sm:$0xff]  ;;  %v867_v40 = vld [vmem:[%s2779_s27 + $0xb8] sm:$0xff]  ;;  %v866_v46 = vld [vmem:[%s2779_s27 + $0xb0] sm:$0xff]  ;;  %s2378_s4 = scalar_lea.hbm %s3061_s0, 40 }
  0xa0   : > { %931 = vmatpush.msrb.mxu2 %v897_v7  ;;  %971 = vmatpush.msrb.mxu0 %v898_v8  ;;  %v883_v28 = vunpack.c.l.bf16 %v851_v27  ;;  %v884_v29 = vunpack.c.h.bf16 %v851_v27  ;;  %v881_v31 = vunpack.c.l.bf16 %v850_v30  ;;  %v882_v32 = vunpack.c.h.bf16 %v850_v30  ;;  %v847_v45 = vld [vmem:[%s2779_s27 + $0x18] sm:$0xff]  ;;  %v846_v51 = vld [vmem:[%s2779_s27 + $0x10] sm:$0xff]  ;;  %v865_v52 = vld [vmem:[%s2779_s27 + $0xa8] sm:$0xff] }
  0xa1   : > { %v879_v35 = vunpack.c.l.bf16 %v849_v33  ;;  %v917_v36 = vunpack.c.l.bf16 %v868_v34  ;;  %v880_v37 = vunpack.c.h.bf16 %v849_v33  ;;  %v918_v38 = vunpack.c.h.bf16 %v868_v34  ;;  %v845_v58 = vld [vmem:[%s2779_s27 + $0x8] sm:$0xff]  ;;  %v864_v59 = vld [vmem:[%s2779_s27 + $0xa0] sm:$0xff]  ;;  %v863_v2 = vld [vmem:[%s2779_s27 + $0x98] sm:$0xff] }
  0xa2   : > { %932 = vmatpush.msrb.mxu2 %v895_v10  ;;  %972 = vmatpush.msrb.mxu0 %v896_v11  ;;  %v877_v41 = vunpack.c.l.bf16 %v848_v39  ;;  %v915_v42 = vunpack.c.l.bf16 %v867_v40  ;;  %v878_v43 = vunpack.c.h.bf16 %v848_v39  ;;  %v916_v44 = vunpack.c.h.bf16 %v867_v40  ;;  %v844_v1 = vld [vmem:[%s2779_s27] sm:$0xff]  ;;  %v862_v7 = vld [vmem:[%s2779_s27 + $0x90] sm:$0xff]  ;;  %v861_v12 = vld [vmem:[%s2779_s27 + $0x88] sm:$0xff] }
  0xa3   : > { %957 = vmatpush.msra.mxu3 %v917_v36  ;;  %997 = vmatpush.msra.mxu1 %v918_v38  ;;  %v875_v47 = vunpack.c.l.bf16 %v847_v45  ;;  %v913_v48 = vunpack.c.l.bf16 %v866_v46  ;;  %v876_v49 = vunpack.c.h.bf16 %v847_v45  ;;  %v914_v50 = vunpack.c.h.bf16 %v866_v46 }
  0xa4   : > { %933 = vmatpush.msrb.mxu2 %v893_v13  ;;  %973 = vmatpush.msrb.mxu0 %v894_v14  ;;  %v873_v54 = vunpack.c.l.bf16 %v846_v51  ;;  %v911_v55 = vunpack.c.l.bf16 %v865_v52  ;;  %v874_v56 = vunpack.c.h.bf16 %v846_v51  ;;  %v912_v57 = vunpack.c.h.bf16 %v865_v52  ;;  %v1064_v52 = vld [vmem:[%s2813_s22 + $0x70] sm:$0xff] }
  0xa5   : > { %958 = vmatpush.msra.mxu3 %v915_v42  ;;  %998 = vmatpush.msra.mxu1 %v916_v44  ;;  %v871_v60 = vunpack.c.l.bf16 %v845_v58  ;;  %v909_v61 = vunpack.c.l.bf16 %v864_v59  ;;  %v872_v62 = vunpack.c.h.bf16 %v845_v58  ;;  %v910_v63 = vunpack.c.h.bf16 %v864_v59  ;;  %v1062_v58 = vld [vmem:[%s2813_s22 + $0x60] sm:$0xff] }
  0xa6   : > { %934 = vmatpush.msrb.mxu2 %v891_v16  ;;  %974 = vmatpush.msrb.mxu0 %v892_v17  ;;  %v869_v3 = vunpack.c.l.bf16 %v844_v1  ;;  %v907_v4 = vunpack.c.l.bf16 %v863_v2  ;;  %v870_v5 = vunpack.c.h.bf16 %v844_v1  ;;  %v908_v6 = vunpack.c.h.bf16 %v863_v2  ;;  %v860_v17 = vld [vmem:[%s2779_s27 + $0x80] sm:$0xff]  ;;  %s2951_s27 = sshll.u32 %s711_s3, 4  ;;  %s1673_s27 = int_to_ptr.vmem [resolvable:$true] %s2951_s27 }
  0xa7   : > { %959 = vmatpush.msra.mxu3 %v913_v48  ;;  %999 = vmatpush.msra.mxu1 %v914_v50  ;;  %v905_v9 = vunpack.c.l.bf16 %v862_v7  ;;  %v906_v10 = vunpack.c.h.bf16 %v862_v7  ;;  %v903_v13 = vunpack.c.l.bf16 %v861_v12  ;;  %v904_v14 = vunpack.c.h.bf16 %v861_v12 }
  0xa8   : > { %935 = vmatpush.msrb.mxu2 %v889_v19  ;;  %975 = vmatpush.msrb.mxu0 %v890_v20  ;;  %v750_v16 = vperm.slane %v747_v53, 1  ;;  %v901_v18 = vunpack.c.l.bf16 %v860_v17  ;;  %v902_v19 = vunpack.c.h.bf16 %v860_v17  ;;  %v1103_v53 = vunpack.c.l.bf16 %v1064_v52 }
  0xa9   : > { %960 = vmatpush.msra.mxu3 %v911_v55  ;;  %1000 = vmatpush.msra.mxu1 %v912_v57  ;;  %v1063_v55 = vld [vmem:[%s2813_s22 + $0x68] sm:$0xff]  ;;  %v1099_v59 = vunpack.c.l.bf16 %v1062_v58 }
  0xaa   : > { %936 = vmatpush.msrb.mxu2 %v887_v22  ;;  %976 = vmatpush.msrb.mxu0 %v888_v23  ;;  %v1102_v57 = vunpack.c.h.bf16 %v1063_v55 }
  0xab   : > { %961 = vmatpush.msra.mxu3 %v909_v61  ;;  %1001 = vmatpush.msra.mxu1 %v910_v63  ;;  %v1061_v61 = vld [vmem:[%s2813_s22 + $0x58] sm:$0xff] }
  0xac   : > { %937 = vmatpush.msrb.mxu2 %v885_v25  ;;  %977 = vmatpush.msrb.mxu0 %v886_v26  ;;  %v1097_v63 = vunpack.c.l.bf16 %v1061_v61 }
  0xad   : > { %962 = vmatpush.msra.mxu3 %v907_v4  ;;  %1002 = vmatpush.msra.mxu1 %v908_v6  ;;  %v1073_v4 = vld [vmem:[%s2813_s22 + $0xb8] sm:$0xff] }
  0xae   : > { %938 = vmatpush.msrb.mxu2 %v883_v28  ;;  %978 = vmatpush.msrb.mxu0 %v884_v29  ;;  %v1121_v7 = vunpack.c.l.bf16 %v1073_v4 }
  0xaf   : > { %963 = vmatpush.msra.mxu3 %v905_v9  ;;  %1003 = vmatpush.msra.mxu1 %v906_v10  ;;  %v1059_v9 = vld [vmem:[%s2813_s22 + $0x48] sm:$0xff]  ;;  %v1072_v10 = vld [vmem:[%s2813_s22 + $0xb0] sm:$0xff] }
  0xb0   : > { %939 = vmatpush.msrb.mxu2 %v881_v31  ;;  %979 = vmatpush.msrb.mxu0 %v882_v32  ;;  %v1094_v12 = vunpack.c.h.bf16 %v1059_v9 }
  0xb1   : > { %964 = vmatpush.msra.mxu3 %v903_v13  ;;  %1004 = vmatpush.msra.mxu1 %v904_v14  ;;  %v1119_v13 = vunpack.c.l.bf16 %v1072_v10  ;;  %v1120_v14 = vunpack.c.h.bf16 %v1072_v10 }
  0xb2   : > { %940 = vmatpush.msrb.mxu2 %v879_v35  ;;  %980 = vmatpush.msrb.mxu0 %v880_v37 }
  0xb3   : > { %965 = vmatpush.msra.mxu3 %v901_v18  ;;  %1005 = vmatpush.msra.mxu1 %v902_v19 }
  0xb4   : > { %941 = vmatpush.msrb.mxu2 %v877_v41  ;;  %981 = vmatpush.msrb.mxu0 %v878_v43 }
  0xb6   : > { %942 = vmatpush.msrb.mxu2 %v875_v47  ;;  %982 = vmatpush.msrb.mxu0 %v876_v49  ;;  %v1065_v49 = vld [vmem:[%s2813_s22 + $0x78] sm:$0xff] }
  0xb7   : > { %v1105_v50 = vunpack.c.l.bf16 %v1065_v49  ;;  %v1106_v51 = vunpack.c.h.bf16 %v1065_v49  ;;  %v1066_v49 = vld [vmem:[%s2813_s22 + $0x80] sm:$0xff] }
  0xb8   : > { %943 = vmatpush.msrb.mxu2 %v873_v54  ;;  %983 = vmatpush.msrb.mxu0 %v874_v56  ;;  %v1104_v54 = vunpack.c.h.bf16 %v1064_v52  ;;  %v1101_v56 = vunpack.c.l.bf16 %v1063_v55  ;;  %v1107_v52 = vunpack.c.l.bf16 %v1066_v49  ;;  %v1052_v55 = vld [vmem:[%s2813_s22 + $0x10] sm:$0xff] }
  0xb9   : > { %1135 = vmatpush.msrb.mxu3 %v1105_v50 }
  0xba   : > { %944 = vmatpush.msrb.mxu2 %v871_v60  ;;  %984 = vmatpush.msrb.mxu0 %v872_v62  ;;  %v1100_v60 = vunpack.c.h.bf16 %v1062_v58  ;;  %v1074_v62 = vld [vmem:[%s2813_s22 + $0xc0] sm:$0xff]  ;;  %v1080_v58 = vunpack.c.h.bf16 %v1052_v55 }
  0xbb   : > { %1136 = vmatpush.msrb.mxu3 %v1103_v53  ;;  %v1123_v1 = vunpack.c.l.bf16 %v1074_v62  ;;  %v1124_v2 = vunpack.c.h.bf16 %v1074_v62  ;;  %v1108_v53 = vunpack.c.h.bf16 %v1066_v49  ;;  %v1264_v49 = vld [vmem:[%s2756_s18 + $0x48] sm:$0xff] }
  0xbc   : > { %945 = vmatpush.msrb.mxu2 %v869_v3  ;;  %985 = vmatpush.msrb.mxu0 %v870_v5  ;;  %v1060_v3 = vld [vmem:[%s2813_s22 + $0x50] sm:$0xff] }
  0xbd   : > { %1137 = vmatpush.msrb.mxu3 %v1101_v56  ;;  %1162 = vmatpush.msrb.mxu1 %v1123_v1  ;;  %v1095_v5 = vunpack.c.l.bf16 %v1060_v3  ;;  %v1096_v6 = vunpack.c.h.bf16 %v1060_v3 }
  0xbe   : > { %1175 = vmatpush.msra.mxu2 %v1106_v51  ;;  %1202 = vmatpush.msra.mxu0 %v1124_v2  ;;  %v1050_v2 = vld [vmem:[%s2813_s22] sm:$0xff] }
  0xbf   : > { %1138 = vmatpush.msrb.mxu3 %v1099_v59  ;;  %1163 = vmatpush.msrb.mxu1 %v1121_v7  ;;  %v1075_v3 = vunpack.c.l.bf16 %v1050_v2 }
  0xc0   : > { %1176 = vmatpush.msra.mxu2 %v1104_v54 }
  0xc1   : > { %1139 = vmatpush.msrb.mxu3 %v1097_v63  ;;  %1164 = vmatpush.msrb.mxu1 %v1119_v13 }
  0xc2   : > { %1177 = vmatpush.msra.mxu2 %v1102_v57  ;;  %v1079_v57 = vunpack.c.l.bf16 %v1052_v55  ;;  %v1262_v55 = vld [vmem:[%s2756_s18 + $0x38] sm:$0xff] }
  0xc3   : > { %1140 = vmatpush.msrb.mxu3 %v1095_v5 }
  0xc4   : > { %1178 = vmatpush.msra.mxu2 %v1100_v60 }
 0x119   : > { %v781_v8 = vpop.f32.mrf.mxu0 }
 0x11a   : > { %v782_v11 = vadd.f32 %v781_v8, %v749_v0  ;;  %v1098_v0 = vunpack.c.h.bf16 %v1061_v61  ;;  %v1122_v8 = vunpack.c.h.bf16 %v1073_v4  ;;  %v1051_v61 = vld [vmem:[%s2813_s22 + $0x8] sm:$0xff]  ;;  %v1076_v4 = vunpack.c.h.bf16 %v1050_v2 }
 0x11b   : > { %v1077_v63 = vunpack.c.l.bf16 %v1051_v61  ;;  %v1279_v2 = vld [vmem:[%s2756_s18 + $0xc0] sm:$0xff] }
 0x11c   : > { %v1977_v15 = vmul.f32 -1.442695, %v782_v11  ;;  %1179 = vmatpush.msra.mxu2 %v1098_v0  ;;  %1203 = vmatpush.msra.mxu0 %v1122_v8  ;;  %v1078_v0 = vunpack.c.h.bf16 %v1051_v61  ;;  %v1260_v61 = vld [vmem:[%s2756_s18 + $0x28] sm:$0xff] }
 0x11e   : > { %2106 = vpow2.f32 %v1977_v15  ;;  %1180 = vmatpush.msra.mxu2 %v1096_v6  ;;  %v1058_v15 = vld [vmem:[%s2813_s22 + $0x40] sm:$0xff]  ;;  %1204 = vmatpush.msra.mxu0 %v1120_v14 }
 0x11f   : > { %v801_v20 = vpop.f32.mrf.mxu2  ;;  %v1091_v17 = vunpack.c.l.bf16 %v1058_v15  ;;  %v1092_v18 = vunpack.c.h.bf16 %v1058_v15 }
 0x120   : > { %v802_v21 = vadd.f32 %v801_v20, %v750_v16  ;;  %v1071_v16 = vld [vmem:[%s2813_s22 + $0xa8] sm:$0xff]  ;;  %1181 = vmatpush.msra.mxu2 %v1094_v12 }
 0x121   : > { %v1117_v19 = vunpack.c.l.bf16 %v1071_v16  ;;  %v1118_v20 = vunpack.c.h.bf16 %v1071_v16 }
 0x122   : > { %v1978_v22 = vmul.f32 -1.442695, %v802_v21  ;;  %1182 = vmatpush.msra.mxu2 %v1092_v18 }
 0x123   : > { %1165 = vmatpush.msrb.mxu1 %v1117_v19  ;;  %1205 = vmatpush.msra.mxu0 %v1118_v20 }
 0x124   : > { %v2107_v23 = vpop.eup %2106  ;;  %2108 = vpow2.f32 %v1978_v22  ;;  %v1070_v22 = vld [vmem:[%s2813_s22 + $0xa0] sm:$0xff] }
 0x125   : > { %v810_v24 = vadd.f32 1.0, %v2107_v23 }
 0x127   : > { %2110 = vrcp.f32 %v810_v24  ;;  %v823_v30 = vand.u32 2147483648, %v810_v24  ;;  %v821_v32 = vand.u32 2147483647, %v810_v24  ;;  %vm817_vm3 = vweird.f32 %v810_v24 }
 0x129   : > { %v824_v36 = vor.u32 1.1754944e-38, %v823_v30  ;;  %vm822_vm5 = vcmp.eq.f32.partialorder %v821_v32, 8.507059e+37 }
 0x12a   : > { %v2109_v25 = vpop.eup %2108 }
 0x12b   : > { %v811_v26 = vadd.f32 1.0, %v2109_v25  ;;  %v1115_v25 = vunpack.c.l.bf16 %v1070_v22 }
 0x12d   : > { %v2111_v27 = vpop.eup %2110  ;;  %2112 = vrcp.f32 %v811_v26  ;;  %v838_v40 = vand.u32 2147483648, %v811_v26  ;;  %v836_v43 = vand.u32 2147483647, %v811_v26  ;;  %vm832_vm7 = vweird.f32 %v811_v26  ;;  %1166 = vmatpush.msrb.mxu1 %v1115_v25 }
 0x12e   : > { %v813_v28 = vmul.f32 %v2111_v27, %v810_v24  ;;  %vm818_vm2 = vweird.f32 %v2111_v27 }
 0x12f   : > { %vm819_vm4 = vmor %vm817_vm3, %vm818_vm2  ;;  %v839_v45 = vor.u32 1.1754944e-38, %v838_v40  ;;  %vm837_vm9 = vcmp.eq.f32.partialorder %v836_v43, 8.507059e+37 }
 0x130   : > { %v814_v29 = vsub.f32 1.0, %v813_v28  ;;  %v1069_v28 = vld [vmem:[%s2813_s22 + $0x98] sm:$0xff] }
 0x131   : > { %v1113_v32 = vunpack.c.l.bf16 %v1069_v28 }
 0x132   : > { %v815_v31 = vmul.f32 %v2111_v27, %v814_v29  ;;  %v2832_v29 = vld [vmem:[%s2749_s23 + $0x1] ss:$4 sm:$0x3] }
 0x133   : > { %v2113_v33 = vpop.eup %2112  ;;  %1167 = vmatpush.msrb.mxu1 %v1113_v32  ;;  %v923_v40 = vperm.slane %v2832_v29, 1  ;;  %v922_v59 = vperm.slane %v2832_v29, 0 }
 0x134   : > { %v816_v34 = vadd.f32 %v2111_v27, %v815_v31  ;;  %v828_v35 = vmul.f32 %v2113_v33, %v811_v26  ;;  %vm833_vm6 = vweird.f32 %v2113_v33  ;;  %v1116_v26 = vunpack.c.h.bf16 %v1070_v22 }
 0x135   : > { %vm834_vm8 = vmor %vm832_vm7, %vm833_vm6 }
 0x136   : > { %v820_v37 = vsel %vm819_vm4, %v2111_v27, %v816_v34  ;;  %v829_v38 = vsub.f32 1.0, %v828_v35  ;;  %v1056_v27 = vld [vmem:[%s2813_s22 + $0x30] sm:$0xff]  ;;  %1206 = vmatpush.msra.mxu0 %v1116_v26  ;;  %v1055_v34 = vld [vmem:[%s2813_s22 + $0x28] sm:$0xff] }
 0x137   : > { %v825_v39 = vsel %vm822_vm5, %v824_v36, %v820_v37  ;;  %v1087_v30 = vunpack.c.l.bf16 %v1056_v27  ;;  %v1088_v31 = vunpack.c.h.bf16 %v1056_v27  ;;  %v1068_v35 = vld [vmem:[%s2813_s22 + $0x90] sm:$0xff]  ;;  %v1085_v36 = vunpack.c.l.bf16 %v1055_v34 }
 0x138   : > { %v842_v41 = vmul.f32 %v825_v39, %v782_v11  ;;  %v830_v42 = vmul.f32 %v2113_v33, %v829_v38  ;;  %v1093_v11 = vunpack.c.l.bf16 %v1059_v9  ;;  %v1086_v37 = vunpack.c.h.bf16 %v1055_v34 }
 0x139   : > { %v1111_v38 = vunpack.c.l.bf16 %v1068_v35  ;;  %v1112_v39 = vunpack.c.h.bf16 %v1068_v35  ;;  %v1270_v35 = vld [vmem:[%s2756_s18 + $0x78] sm:$0xff] }
 0x13a   : > { %v831_v44 = vadd.f32 %v2113_v33, %v830_v42  ;;  %946 = vmatmul.f32.vlgmr.msrb.gmra.mxu2 %v842_v41  ;;  %986 = vmatmul.f32.vlgmr.msrb.gmra.mxu0 %v842_v41  ;;  %v1054_v41 = vld [vmem:[%s2813_s22 + $0x20] sm:$0xff]  ;;  %v1067_v42 = vld [vmem:[%s2813_s22 + $0x88] sm:$0xff] }
 0x13b   : > { %1141 = vmatpush.msrb.mxu3 %v1093_v11  ;;  %1168 = vmatpush.msrb.mxu1 %v1111_v38  ;;  %v1310_v38 = vunpack.c.l.bf16 %v1270_v35 }
 0x13c   : > { %v835_v46 = vsel %vm834_vm8, %v2113_v33, %v831_v44  ;;  %v1114_v33 = vunpack.c.h.bf16 %v1069_v28  ;;  %v1083_v44 = vunpack.c.l.bf16 %v1054_v41 }
 0x13d   : > { %v840_v47 = vsel %vm837_vm9, %v839_v45, %v835_v46  ;;  %1142 = vmatpush.msrb.mxu3 %v1091_v17  ;;  %v1084_v45 = vunpack.c.h.bf16 %v1054_v41  ;;  %v1109_v46 = vunpack.c.l.bf16 %v1067_v42  ;;  %v1267_v41 = vld [vmem:[%s2756_s18 + $0x60] sm:$0xff] }
 0x13e   : > { %v843_v48 = vmul.f32 %v840_v47, %v802_v21  ;;  %v1057_v21 = vld [vmem:[%s2813_s22 + $0x38] sm:$0xff]  ;;  %1207 = vmatpush.msra.mxu0 %v1114_v33  ;;  %v1110_v47 = vunpack.c.h.bf16 %v1067_v42  ;;  %v1304_v42 = vunpack.c.l.bf16 %v1267_v41 }
 0x13f   : > { %v1089_v23 = vunpack.c.l.bf16 %v1057_v21  ;;  %v1090_v24 = vunpack.c.h.bf16 %v1057_v21  ;;  %1169 = vmatpush.msrb.mxu1 %v1109_v46  ;;  %v1265_v46 = vld [vmem:[%s2756_s18 + $0x50] sm:$0xff] }
 0x140   : > { %1980 = vmatmul.msk.f32.vlgmr.msra.gmra.mxu3 %vm926_vm10, %v843_v48  ;;  %1981 = vmatmul.msk.f32.vlgmr.msra.gmra.mxu1 %vm926_vm10, %v843_v48  ;;  %v1053_v48 = vld [vmem:[%s2813_s22 + $0x18] sm:$0xff] }
 0x141   : > { %1143 = vmatpush.msrb.mxu3 %v1089_v23  ;;  %1183 = vmatpush.msra.mxu2 %v1090_v24  ;;  %v1081_v50 = vunpack.c.l.bf16 %v1053_v48  ;;  %v1082_v51 = vunpack.c.h.bf16 %v1053_v48 }
 0x142   : > { %1208 = vmatpush.msra.mxu0 %v1112_v39  ;;  %1170 = vmatpush.msrb.mxu1 %v1107_v52  ;;  %v1263_v52 = vld [vmem:[%s2756_s18 + $0x40] sm:$0xff] }
 0x143   : > { %1144 = vmatpush.msrb.mxu3 %v1087_v30  ;;  %1184 = vmatpush.msra.mxu2 %v1088_v31 }
 0x144   : > { %1209 = vmatpush.msra.mxu0 %v1110_v47  ;;  %1340 = vmatpush.msra.mxu1 %v1310_v38  ;;  %v1300_v47 = vunpack.c.l.bf16 %v1265_v46 }
 0x145   : > { %1145 = vmatpush.msrb.mxu3 %v1085_v36  ;;  %1185 = vmatpush.msra.mxu2 %v1086_v37  ;;  %v1269_v36 = vld [vmem:[%s2756_s18 + $0x70] sm:$0xff]  ;;  %v1268_v37 = vld [vmem:[%s2756_s18 + $0x68] sm:$0xff] }
 0x146   : > { %1210 = vmatpush.msra.mxu0 %v1108_v53  ;;  %v1308_v39 = vunpack.c.l.bf16 %v1269_v36  ;;  %v1309_v48 = vunpack.c.h.bf16 %v1269_v36  ;;  %v1296_v53 = vunpack.c.l.bf16 %v1263_v52 }
 0x147   : > { %1146 = vmatpush.msrb.mxu3 %v1083_v44  ;;  %1186 = vmatpush.msra.mxu2 %v1084_v45  ;;  %v1311_v45 = vunpack.c.h.bf16 %v1270_v35 }
 0x148   : > { %1341 = vmatpush.msra.mxu1 %v1308_v39 }
 0x149   : > { %1147 = vmatpush.msrb.mxu3 %v1081_v50  ;;  %1187 = vmatpush.msra.mxu2 %v1082_v51  ;;  %v1298_v50 = vunpack.c.l.bf16 %v1264_v49  ;;  %v1307_v51 = vunpack.c.h.bf16 %v1268_v37 }
 0x14a   : > { %1380 = vmatpush.msrb.mxu0 %v1311_v45 }
 0x14b   : > { %1148 = vmatpush.msrb.mxu3 %v1079_v57  ;;  %1188 = vmatpush.msra.mxu2 %v1080_v58  ;;  %v1261_v58 = vld [vmem:[%s2756_s18 + $0x30] sm:$0xff] }
 0x14c   : > { %1381 = vmatpush.msrb.mxu0 %v1309_v48 }
 0x14d   : > { %1149 = vmatpush.msrb.mxu3 %v1077_v63  ;;  %1189 = vmatpush.msra.mxu2 %v1078_v0  ;;  %v1299_v63 = vunpack.c.h.bf16 %v1264_v49  ;;  %v1259_v0 = vld [vmem:[%s2756_s18 + $0x20] sm:$0xff] }
 0x14e   : > { %1382 = vmatpush.msrb.mxu0 %v1307_v51 }
 0x14f   : > { %1150 = vmatpush.msrb.mxu3 %v1075_v3  ;;  %1190 = vmatpush.msra.mxu2 %v1076_v4  ;;  %v1328_v3 = vunpack.c.l.bf16 %v1279_v2  ;;  %v1297_v4 = vunpack.c.h.bf16 %v1263_v52 }
 0x151   : > { %1367 = vmatpush.msra.mxu3 %v1328_v3 }
 0x1b7   : > { %v987_v43 = vpop.f32.mrf.mxu0 }
 0x1b8   : > { %v988_v54 = vadd.f32 %v987_v43, %v923_v40  ;;  %v1306_v40 = vunpack.c.l.bf16 %v1268_v37  ;;  %v1266_v43 = vld [vmem:[%s2756_s18 + $0x58] sm:$0xff]  ;;  %v1272_v37 = vld [vmem:[%s2756_s18 + $0x88] sm:$0xff] }
 0x1b9   : > { %v1302_v44 = vunpack.c.l.bf16 %v1266_v43  ;;  %v1303_v57 = vunpack.c.h.bf16 %v1266_v43  ;;  %v1314_v38 = vunpack.c.l.bf16 %v1272_v37  ;;  %v1271_v43 = vld [vmem:[%s2756_s18 + $0x80] sm:$0xff] }
 0x1ba   : > { %1342 = vmatpush.msra.mxu1 %v1306_v40 }
 0x1bc   : > { %1343 = vmatpush.msra.mxu1 %v1304_v42 }
 0x1bd   : > { %v1007_v56 = vpop.f32.mrf.mxu1  ;;  %v947_v62 = vpop.f32.mrf.mxu2 }
 0x1be   : > { %v1008_v60 = vadd.f32 %v1007_v56, %v988_v54  ;;  %v948_v5 = vadd.f32 %v947_v62, %v922_v59  ;;  %1344 = vmatpush.msra.mxu1 %v1302_v44  ;;  %v1305_v54 = vunpack.c.h.bf16 %v1267_v41  ;;  %v1294_v56 = vunpack.c.l.bf16 %v1262_v55 }
 0x1bf   : > { %v1292_v59 = vunpack.c.l.bf16 %v1261_v58  ;;  %v1290_v62 = vunpack.c.l.bf16 %v1260_v61 }
 0x1c0   : > { %v1983_v1 = vmul.f32 -1.442695, %v1008_v60  ;;  %1345 = vmatpush.msra.mxu1 %v1300_v47  ;;  %1383 = vmatpush.msrb.mxu0 %v1305_v54 }
 0x1c2   : > { %2114 = vpow2.f32 %v1983_v1  ;;  %1346 = vmatpush.msra.mxu1 %v1298_v50  ;;  %1384 = vmatpush.msrb.mxu0 %v1303_v57  ;;  %v1288_v1 = vunpack.c.l.bf16 %v1259_v0  ;;  %v1315_v57 = vunpack.c.h.bf16 %v1272_v37 }
 0x1c3   : > { %v967_v6 = vpop.f32.mrf.mxu3 }
 0x1c4   : > { %v968_v7 = vadd.f32 %v967_v6, %v948_v5  ;;  %1347 = vmatpush.msra.mxu1 %v1296_v53  ;;  %v1258_v5 = vld [vmem:[%s2756_s18 + $0x18] sm:$0xff] }
 0x1c5   : > { %v1286_v6 = vunpack.c.l.bf16 %v1258_v5 }
 0x1c6   : > { %v1982_v8 = vmul.f32 -1.442695, %v968_v7  ;;  %1348 = vmatpush.msra.mxu1 %v1294_v56 }
 0x1c8   : > { %v2115_v9 = vpop.eup %2114  ;;  %2116 = vpow2.f32 %v1982_v8  ;;  %1349 = vmatpush.msra.mxu1 %v1292_v59 }
 0x1c9   : > { %v1017_v10 = vadd.f32 1.0, %v2115_v9  ;;  %v1295_v9 = vunpack.c.h.bf16 %v1262_v55 }
 0x1ca   : > { %1350 = vmatpush.msra.mxu1 %v1290_v62 }
 0x1cb   : > { %2118 = vrcp.f32 %v1017_v10  ;;  %v1044_v16 = vand.u32 2147483648, %v1017_v10  ;;  %v1042_v18 = vand.u32 2147483647, %v1017_v10  ;;  %vm1038_vm12 = vweird.f32 %v1017_v10 }
 0x1cc   : > { %1351 = vmatpush.msra.mxu1 %v1288_v1 }
 0x1cd   : > { %v1045_v22 = vor.u32 1.1754944e-38, %v1044_v16  ;;  %vm1043_vm14 = vcmp.eq.f32.partialorder %v1042_v18, 8.507059e+37 }
 0x1ce   : > { %v2117_v11 = vpop.eup %2116  ;;  %1352 = vmatpush.msra.mxu1 %v1286_v6 }
 0x1cf   : > { %v1016_v12 = vadd.f32 1.0, %v2117_v11 }
 0x1d1   : > { %v2119_v13 = vpop.eup %2118  ;;  %2120 = vrcp.f32 %v1016_v12  ;;  %v1029_v26 = vand.u32 2147483648, %v1016_v12  ;;  %v1027_v29 = vand.u32 2147483647, %v1016_v12  ;;  %vm1023_vm0 = vweird.f32 %v1016_v12 }
 0x1d2   : > { %v1034_v14 = vmul.f32 %v2119_v13, %v1017_v10  ;;  %vm1039_vm11 = vweird.f32 %v2119_v13  ;;  %v1257_v10 = vld [vmem:[%s2756_s18 + $0x10] sm:$0xff] }
 0x1d3   : > { %vm1040_vm13 = vmor %vm1038_vm12, %vm1039_vm11  ;;  %v1030_v31 = vor.u32 1.1754944e-38, %v1029_v26  ;;  %vm1028_vm2 = vcmp.eq.f32.partialorder %v1027_v29, 8.507059e+37  ;;  %v1284_v11 = vunpack.c.l.bf16 %v1257_v10  ;;  %v1329_v26 = vunpack.c.h.bf16 %v1279_v2 }
 0x1d4   : > { %v1035_v15 = vsub.f32 1.0, %v1034_v14  ;;  %v1293_v14 = vunpack.c.h.bf16 %v1261_v58  ;;  %v1287_v29 = vunpack.c.h.bf16 %v1258_v5  ;;  %v1285_v35 = vunpack.c.h.bf16 %v1257_v10 }
 0x1d5   : > { %1353 = vmatpush.msra.mxu1 %v1284_v11  ;;  %v1313_v58 = vunpack.c.h.bf16 %v1271_v43 }
 0x1d6   : > { %v1036_v17 = vmul.f32 %v2119_v13, %v1035_v15  ;;  %v1256_v15 = vld [vmem:[%s2756_s18 + $0x8] sm:$0xff] }
 0x1d7   : > { %v2121_v19 = vpop.eup %2120  ;;  %v1282_v16 = vunpack.c.l.bf16 %v1256_v15  ;;  %v1283_v39 = vunpack.c.h.bf16 %v1256_v15 }
 0x1d8   : > { %v1037_v20 = vadd.f32 %v2119_v13, %v1036_v17  ;;  %v1019_v21 = vmul.f32 %v2121_v19, %v1016_v12  ;;  %vm1024_vm15 = vweird.f32 %v2121_v19  ;;  %v1277_v12 = vld [vmem:[%s2756_s18 + $0xb0] sm:$0xff]  ;;  %v1276_v17 = vld [vmem:[%s2756_s18 + $0xa8] sm:$0xff] }
 0x1d9   : > { %vm1025_vm1 = vmor %vm1023_vm0, %vm1024_vm15  ;;  %v1322_v18 = vunpack.c.l.bf16 %v1276_v17  ;;  %1354 = vmatpush.msra.mxu1 %v1282_v16  ;;  %v1325_v36 = vunpack.c.h.bf16 %v1277_v12  ;;  %v1323_v40 = vunpack.c.h.bf16 %v1276_v17 }
 0x1da   : > { %v1041_v23 = vsel %vm1040_vm13, %v2119_v13, %v1037_v20  ;;  %v1020_v24 = vsub.f32 1.0, %v1019_v21  ;;  %v1324_v13 = vunpack.c.l.bf16 %v1277_v12  ;;  %v1255_v20 = vld [vmem:[%s2756_s18] sm:$0xff] }
 0x1db   : > { %v1046_v25 = vsel %vm1043_vm14, %v1045_v22, %v1041_v23  ;;  %v1280_v21 = vunpack.c.l.bf16 %v1255_v20  ;;  %v1275_v22 = vld [vmem:[%s2756_s18 + $0xa0] sm:$0xff]  ;;  %v1984_v23 = vld [vmem:[%s2749_s23 + $0x2] ss:$4 sm:$0x3]  ;;  %v1281_v47 = vunpack.c.h.bf16 %v1255_v20 }
 0x1dc   : > { %v1049_v27 = vmul.f32 %v1046_v25, %v1008_v60  ;;  %v1021_v28 = vmul.f32 %v2121_v19, %v1020_v24  ;;  %v1301_v60 = vunpack.c.h.bf16 %v1265_v46  ;;  %v1320_v24 = vunpack.c.l.bf16 %v1275_v22 }
 0x1dd   : > { %v1289_v25 = vunpack.c.h.bf16 %v1259_v0  ;;  %1355 = vmatpush.msra.mxu1 %v1280_v21  ;;  %v1312_v46 = vunpack.c.l.bf16 %v1271_v43  ;;  %v1321_v50 = vunpack.c.h.bf16 %v1275_v22  ;;  %v1547_v22 = vld [vmem:[%s2885_s25 + $0x78] sm:$0xff]  ;;  %v1538_v43 = vld [vmem:[%s2885_s25 + $0x30] sm:$0xff] }
 0x1de   : > { %v1022_v30 = vadd.f32 %v2121_v19, %v1021_v28  ;;  %1985 = vmatmul.msk.f32.vlgmr.msrb.gmra.mxu1 %vm926_vm10, %v1049_v27  ;;  %1986 = vmatmul.msk.f32.vlgmr.msra.gmra.mxu0 %vm926_vm10, %v1049_v27  ;;  %v1274_v27 = vld [vmem:[%s2756_s18 + $0x98] sm:$0xff] }
 0x1df   : > { %1385 = vmatpush.msrb.mxu0 %v1301_v60  ;;  %v1318_v28 = vunpack.c.l.bf16 %v1274_v27  ;;  %1407 = vmatpush.msrb.mxu1 %v1329_v26  ;;  %v1319_v53 = vunpack.c.h.bf16 %v1274_v27  ;;  %v1545_v26 = vld [vmem:[%s2885_s25 + $0x68] sm:$0xff] }
 0x1e0   : > { %v1026_v32 = vsel %vm1025_vm1, %v2121_v19, %v1022_v30  ;;  %v1291_v19 = vunpack.c.h.bf16 %v1260_v61  ;;  %1561 = vmatpush.msrb.mxu2 %v1547_v22 }
 0x1e1   : > { %v1031_v33 = vsel %vm1028_vm2, %v1030_v31, %v1026_v32  ;;  %1386 = vmatpush.msrb.mxu0 %v1299_v63  ;;  %v1128_v31 = vperm.slane %v1984_v23, 0  ;;  %v1273_v32 = vld [vmem:[%s2756_s18 + $0x90] sm:$0xff] }
 0x1e2   : > { %v1048_v34 = vmul.f32 %v1031_v33, %v968_v7  ;;  %v1278_v7 = vld [vmem:[%s2756_s18 + $0xb8] sm:$0xff]  ;;  %v1129_v33 = vperm.slane %v1984_v23, 1  ;;  %v1317_v54 = vunpack.c.h.bf16 %v1273_v32  ;;  %s3059_s18 = sld [smem:[#allocation33_spill]] }
 0x1e3   : > { %1387 = vmatpush.msrb.mxu0 %v1297_v4  ;;  %v1326_v8 = vunpack.c.l.bf16 %v1278_v7  ;;  %v1327_v30 = vunpack.c.h.bf16 %v1278_v7 }
 0x1e4   : > { %1151 = vmatmul.f32.vlgmr.msrb.gmra.mxu3 %v1048_v34  ;;  %1191 = vmatmul.f32.vlgmr.msra.gmra.mxu2 %v1048_v34  ;;  %v1316_v34 = vunpack.c.l.bf16 %v1273_v32  ;;  %v1542_v32 = vld [vmem:[%s2885_s25 + $0x50] sm:$0xff] }
 0x1e5   : > { %1368 = vmatpush.msra.mxu3 %v1326_v8  ;;  %1388 = vmatpush.msrb.mxu0 %v1295_v9 }
 0x1e6   : > { %1408 = vmatpush.msrb.mxu1 %v1327_v30  ;;  %v1543_v30 = vld [vmem:[%s2885_s25 + $0x58] sm:$0xff] }
 0x1e7   : > { %1369 = vmatpush.msra.mxu3 %v1324_v13  ;;  %1389 = vmatpush.msrb.mxu0 %v1293_v14 }
 0x1e8   : > { %1409 = vmatpush.msrb.mxu1 %v1325_v36  ;;  %s2879_s13 = scalar_lea.vmem %s3059_s18, %s2773_s19  ;;  %v1540_v36 = vld [vmem:[%s2885_s25 + $0x40] sm:$0xff] }
 0x1e9   : > { %1370 = vmatpush.msra.mxu3 %v1322_v18  ;;  %1390 = vmatpush.msrb.mxu0 %v1291_v19  ;;  %v1475_v21 = vld [vmem:[%s2879_s13 + $0x78] sm:$0xff]  ;;  %v1474_v23 = vld [vmem:[%s2879_s13 + $0x70] sm:$0xff]  ;;  %v1472_v27 = vld [vmem:[%s2879_s13 + $0x60] sm:$0xff] }
 0x1ea   : > { %1410 = vmatpush.msrb.mxu1 %v1323_v40  ;;  %v1467_v37 = vld [vmem:[%s2879_s13 + $0x38] sm:$0xff]  ;;  %v1556_v40 = vld [vmem:[%s2885_s25 + $0xc0] sm:$0xff] }
 0x1eb   : > { %1371 = vmatpush.msra.mxu3 %v1320_v24  ;;  %1391 = vmatpush.msrb.mxu0 %v1289_v25  ;;  %v1546_v24 = vld [vmem:[%s2885_s25 + $0x70] sm:$0xff]  ;;  %v1473_v25 = vld [vmem:[%s2879_s13 + $0x68] sm:$0xff] }
 0x1ec   : > { %1411 = vmatpush.msrb.mxu1 %v1321_v50  ;;  %1562 = vmatpush.msrb.mxu2 %v1546_v24  ;;  %v1481_v50 = vld [vmem:[%s2879_s13 + $0xa8] sm:$0xff] }
 0x1ed   : > { %1372 = vmatpush.msra.mxu3 %v1318_v28  ;;  %1392 = vmatpush.msrb.mxu0 %v1287_v29  ;;  %v1544_v28 = vld [vmem:[%s2885_s25 + $0x60] sm:$0xff]  ;;  %v1471_v29 = vld [vmem:[%s2879_s13 + $0x58] sm:$0xff] }
 0x1ee   : > { %1412 = vmatpush.msrb.mxu1 %v1319_v53  ;;  %1563 = vmatpush.msrb.mxu2 %v1545_v26  ;;  %v1553_v53 = vld [vmem:[%s2885_s25 + $0xa8] sm:$0xff] }
 0x1ef   : > { %1373 = vmatpush.msra.mxu3 %v1316_v34  ;;  %1393 = vmatpush.msrb.mxu0 %v1285_v35  ;;  %v1541_v34 = vld [vmem:[%s2885_s25 + $0x48] sm:$0xff]  ;;  %v1468_v35 = vld [vmem:[%s2879_s13 + $0x40] sm:$0xff] }
 0x1f0   : > { %1413 = vmatpush.msrb.mxu1 %v1317_v54  ;;  %1564 = vmatpush.msrb.mxu2 %v1544_v28 }
 0x1f1   : > { %1374 = vmatpush.msra.mxu3 %v1314_v38  ;;  %1394 = vmatpush.msrb.mxu0 %v1283_v39  ;;  %v1484_v38 = vld [vmem:[%s2879_s13 + $0xc0] sm:$0xff]  ;;  %v1539_v39 = vld [vmem:[%s2885_s25 + $0x38] sm:$0xff] }
 0x1f2   : > { %1414 = vmatpush.msrb.mxu1 %v1315_v57  ;;  %1565 = vmatpush.msrb.mxu2 %v1543_v30  ;;  %v1535_v57 = vld [vmem:[%s2885_s25 + $0x18] sm:$0xff] }
 0x1f3   : > { %1375 = vmatpush.msra.mxu3 %v1312_v46  ;;  %1395 = vmatpush.msrb.mxu0 %v1281_v47  ;;  %v1482_v46 = vld [vmem:[%s2879_s13 + $0xb0] sm:$0xff]  ;;  %v1537_v47 = vld [vmem:[%s2885_s25 + $0x28] sm:$0xff] }
 0x1f4   : > { %1415 = vmatpush.msrb.mxu1 %v1313_v58  ;;  %1566 = vmatpush.msrb.mxu2 %v1542_v32  ;;  %v1552_v58 = vld [vmem:[%s2885_s25 + $0xa0] sm:$0xff] }
 0x1f5   : > { %1492 = vmatpush.msrb.mxu3 %v1475_v21  ;;  %1588 = vmatpush.msra.mxu0 %v1556_v40 }
 0x1f6   : > { %1567 = vmatpush.msrb.mxu2 %v1541_v34 }
 0x1f7   : > { %1493 = vmatpush.msrb.mxu3 %v1474_v23 }
 0x1f8   : > { %1568 = vmatpush.msrb.mxu2 %v1540_v36 }
 0x1f9   : > { %1494 = vmatpush.msrb.mxu3 %v1473_v25 }
 0x1fa   : > { %1569 = vmatpush.msrb.mxu2 %v1539_v39 }
 0x1fb   : > { %1495 = vmatpush.msrb.mxu3 %v1472_v27 }
 0x1fc   : > { %1570 = vmatpush.msrb.mxu2 %v1538_v43 }
 0x1fd   : > { %1496 = vmatpush.msrb.mxu3 %v1471_v29 }
 0x1fe   : > { %1571 = vmatpush.msrb.mxu2 %v1537_v47  ;;  %v2103_v47 = vld [vmem:[%s617_s20] ss:$0 sm:$0xff] }
 0x25b   : > { %v1172_v48 = vpop.f32.mrf.mxu1  ;;  %v1212_v49 = vpop.f32.mrf.mxu0 }
 0x267   : > { %v1152_v41 = vpop.f32.mrf.mxu3  ;;  %v1192_v42 = vpop.f32.mrf.mxu2 }
 0x268   : > { %v1153_v44 = vadd.f32 %v1152_v41, %v1128_v31  ;;  %v1193_v45 = vadd.f32 %v1192_v42, %v1129_v33  ;;  %v1470_v31 = vld [vmem:[%s2879_s13 + $0x50] sm:$0xff]  ;;  %v1469_v33 = vld [vmem:[%s2879_s13 + $0x48] sm:$0xff]  ;;  %v1483_v42 = vld [vmem:[%s2879_s13 + $0xb8] sm:$0xff] }
 0x269   : > { %1497 = vmatpush.msrb.mxu3 %v1470_v31  ;;  %v1466_v41 = vld [vmem:[%s2879_s13 + $0x30] sm:$0xff] }
 0x26a   : > { %v1173_v51 = vadd.f32 %v1172_v48, %v1153_v44  ;;  %v1213_v52 = vadd.f32 %v1212_v49, %v1193_v45  ;;  %v1555_v44 = vld [vmem:[%s2885_s25 + $0xb8] sm:$0xff]  ;;  %v1465_v45 = vld [vmem:[%s2879_s13 + $0x28] sm:$0xff]  ;;  %v1554_v48 = vld [vmem:[%s2885_s25 + $0xb0] sm:$0xff] }
 0x26b   : > { %1498 = vmatpush.msrb.mxu3 %v1469_v33  ;;  %1589 = vmatpush.msra.mxu0 %v1555_v44  ;;  %v1464_v49 = vld [vmem:[%s2879_s13 + $0x20] sm:$0xff] }
 0x26c   : > { %v1987_v55 = vmul.f32 -1.442695, %v1173_v51  ;;  %v1988_v56 = vmul.f32 -1.442695, %v1213_v52 }
 0x26d   : > { %1499 = vmatpush.msrb.mxu3 %v1468_v35  ;;  %1590 = vmatpush.msra.mxu0 %v1554_v48 }
 0x26e   : > { %2122 = vpow2.f32 %v1987_v55  ;;  %v1463_v55 = vld [vmem:[%s2879_s13 + $0x18] sm:$0xff] }
 0x26f   : > { %2124 = vpow2.f32 %v1988_v56  ;;  %1500 = vmatpush.msrb.mxu3 %v1467_v37  ;;  %1591 = vmatpush.msra.mxu0 %v1553_v53  ;;  %v1480_v56 = vld [vmem:[%s2879_s13 + $0xa0] sm:$0xff] }
 0x271   : > { %1501 = vmatpush.msrb.mxu3 %v1466_v41  ;;  %1592 = vmatpush.msra.mxu0 %v1552_v58 }
 0x273   : > { %1502 = vmatpush.msrb.mxu3 %v1465_v45 }
 0x274   : > { %v2123_v59 = vpop.eup %2122 }
 0x275   : > { %v2125_v60 = vpop.eup %2124  ;;  %v1221_v61 = vadd.f32 1.0, %v2123_v59  ;;  %1503 = vmatpush.msrb.mxu3 %v1464_v49 }
 0x276   : > { %v1222_v62 = vadd.f32 1.0, %v2125_v60  ;;  %v1462_v60 = vld [vmem:[%s2879_s13 + $0x10] sm:$0xff] }
 0x277   : > { %2126 = vrcp.f32 %v1221_v61  ;;  %v1234_v4 = vand.u32 2147483648, %v1221_v61  ;;  %v1232_v7 = vand.u32 2147483647, %v1221_v61  ;;  %vm1228_vm5 = vweird.f32 %v1221_v61  ;;  %1504 = vmatpush.msrb.mxu3 %v1463_v55 }
 0x278   : > { %2128 = vrcp.f32 %v1222_v62  ;;  %v1249_v8 = vand.u32 2147483648, %v1222_v62  ;;  %v1247_v10 = vand.u32 2147483647, %v1222_v62  ;;  %vm1243_vm7 = vweird.f32 %v1222_v62 }
 0x279   : > { %v1235_v12 = vor.u32 1.1754944e-38, %v1234_v4  ;;  %vm1233_vm8 = vcmp.eq.f32.partialorder %v1232_v7, 8.507059e+37  ;;  %1505 = vmatpush.msrb.mxu3 %v1462_v60  ;;  %v1533_v4 = vld [vmem:[%s2885_s25 + $0x8] sm:$0xff]  ;;  %v1460_v7 = vld [vmem:[%s2879_s13] sm:$0xff] }
 0x27a   : > { %v1250_v15 = vor.u32 1.1754944e-38, %v1249_v8  ;;  %vm1248_vm11 = vcmp.eq.f32.partialorder %v1247_v10, 8.507059e+37  ;;  %v1477_v8 = vld [vmem:[%s2879_s13 + $0x88] sm:$0xff] }
 0x27d   : > { %v2127_v63 = vpop.eup %2126 }
 0x27e   : > { %v2129_v0 = vpop.eup %2128  ;;  %v1224_v1 = vmul.f32 %v2127_v63, %v1221_v61  ;;  %vm1229_vm3 = vweird.f32 %v2127_v63  ;;  %v1479_v61 = vld [vmem:[%s2879_s13 + $0x98] sm:$0xff] }
 0x27f   : > { %v1239_v2 = vmul.f32 %v2129_v0, %v1222_v62  ;;  %vm1244_vm4 = vweird.f32 %v2129_v0  ;;  %vm1230_vm6 = vmor %vm1228_vm5, %vm1229_vm3  ;;  %v1534_v62 = vld [vmem:[%s2885_s25 + $0x10] sm:$0xff] }
 0x280   : > { %v1225_v3 = vsub.f32 1.0, %v1224_v1  ;;  %vm1245_vm9 = vmor %vm1243_vm7, %vm1244_vm4 }
 0x281   : > { %v1240_v5 = vsub.f32 1.0, %v1239_v2  ;;  %v1461_v2 = vld [vmem:[%s2879_s13 + $0x8] sm:$0xff] }
 0x282   : > { %v1226_v6 = vmul.f32 %v2127_v63, %v1225_v3  ;;  %v1478_v3 = vld [vmem:[%s2879_s13 + $0x90] sm:$0xff]  ;;  %1506 = vmatpush.msrb.mxu3 %v1461_v2 }
 0x283   : > { %v1241_v9 = vmul.f32 %v2129_v0, %v1240_v5  ;;  %v1550_v5 = vld [vmem:[%s2885_s25 + $0x90] sm:$0xff] }
 0x284   : > { %v1227_v11 = vadd.f32 %v2127_v63, %v1226_v6  ;;  %1507 = vmatpush.msrb.mxu3 %v1460_v7 }
 0x285   : > { %v1242_v13 = vadd.f32 %v2129_v0, %v1241_v9  ;;  %v1532_v9 = vld [vmem:[%s2885_s25] sm:$0xff] }
 0x286   : > { %v1231_v14 = vsel %vm1230_vm6, %v2127_v63, %v1227_v11 }
 0x287   : > { %v1236_v16 = vsel %vm1233_vm8, %v1235_v12, %v1231_v14  ;;  %v1246_v17 = vsel %vm1245_vm9, %v2129_v0, %v1242_v13  ;;  %v1551_v0 = vld [vmem:[%s2885_s25 + $0x98] sm:$0xff]  ;;  %v1549_v12 = vld [vmem:[%s2885_s25 + $0x88] sm:$0xff] }
 0x288   : > { %v1253_v18 = vmul.f32 %v1236_v16, %v1173_v51  ;;  %v1251_v19 = vsel %vm1248_vm11, %v1250_v15, %v1246_v17  ;;  %v1536_v51 = vld [vmem:[%s2885_s25 + $0x20] sm:$0xff]  ;;  %1593 = vmatpush.msra.mxu0 %v1551_v0 }
 0x289   : > { %v1254_v20 = vmul.f32 %v1251_v19, %v1213_v52  ;;  %v1989_v52 = vld [vmem:[%s2749_s23 + $0x3] ss:$4 sm:$0x3]  ;;  %1572 = vmatpush.msrb.mxu2 %v1536_v51  ;;  %v1476_v15 = vld [vmem:[%s2879_s13 + $0x80] sm:$0xff]  ;;  %s1998_s23 = sshll.u32 %s2565_s29, 3 }
 0x28a   : > { %1356 = vmatmul.f32.vlgmr.msra.gmra.mxu1 %v1253_v18  ;;  %1396 = vmatmul.f32.vlgmr.msrb.gmra.mxu0 %v1253_v18  ;;  %v1333_v59 = vperm.slane %v1989_v52, 0  ;;  %v1334_v63 = vperm.slane %v1989_v52, 1  ;;  %v1548_v16 = vld [vmem:[%s2885_s25 + $0x80] sm:$0xff]  ;;  %s1670_s6 = scalar_lea.hbm %s3061_s0, %s1998_s23  ;;  %v2104_v52 = vld [vmem:[#allocation11] ss:$0 sm:$0xff] }
 0x28b   : > { %1990 = vmatmul.msk.f32.vlgmr.msra.gmra.mxu3 %vm926_vm10, %v1254_v20  ;;  %1519 = vmatpush.msra.mxu1 %v1484_v38  ;;  %s1674_s2 = sshll.u32 %s1670_s6, 4  ;;  %s1675_s2 = int_to_ptr.hbm [resolvable:$true] %s1674_s2 }
 0x28c   : > { %1573 = vmatpush.msrb.mxu2 %v1535_v57  ;;  %1594 = vmatpush.msra.mxu0 %v1550_v5  ;;  %s2372_s20 = sshra.s32 %s1675_s2, 4  ;;  %s2373_s20 = int_to_ptr.hbm [resolvable:$true] %s2372_s20 }
 0x28d   : > { %1520 = vmatpush.msra.mxu1 %v1483_v42  ;;  %s2374_s21 = scalar_lea.hbm %s2373_s20, 8  ;;  %p2379_p2 = scmp.lt.s32.totalorder %s2373_s20, %s3061_s0 }
 0x28e   : > { %1574 = vmatpush.msrb.mxu2 %v1534_v62  ;;  %1595 = vmatpush.msra.mxu0 %v1549_v12  ;;  %p2375_p6 = scmp.ne.s32.totalorder %s2373_s20, %s2374_s21  ;;  %p2380_p4 = scmp.lt.s32.totalorder %s2378_s4, %s2374_s21 }
 0x28f   : > { %1521 = vmatpush.msra.mxu1 %v1482_v46  ;;  %v2102_v46 = vld [vmem:[%s608_s12] ss:$0 sm:$0xff]  ;;  %s1655_s12 = scalar_lea.sflag [#allocation4], %s2736_s8 }
 0x290   : > { %1575 = vmatpush.msrb.mxu2 %v1533_v4  ;;  %1596 = vmatpush.msra.mxu0 %v1548_v16  ;;  %p2376_p10 = pnand %p2375_p6, %p2596_p11  ;;  %p2381_p5 = por %p2380_p4, %p2379_p2 }
 0x291   : > { %1522 = vmatpush.msra.mxu1 %v1481_v50 }
 0x292   : > { %1991 = vmatmul.msk.f32.vlgmr.msrb.gmra.mxu1 %vm926_vm10, %v1254_v20  ;;  %1576 = vmatpush.msrb.mxu2 %v1532_v9  ;;  %p2377_p0 = pneg %p2376_p10 }
 0x293   : > { %1523 = vmatpush.msra.mxu1 %v1480_v56 }
 0x294   : > { %p2382_p8 = pnand %p2381_p5, %p2377_p0 }
 0x295   : > { %1524 = vmatpush.msra.mxu1 %v1479_v61 }
 0x297   : > { %1525 = vmatpush.msra.mxu1 %v1478_v3 }
 0x299   : > { %1526 = vmatpush.msra.mxu1 %v1477_v8 }
 0x29b   : > { %1527 = vmatpush.msra.mxu1 %v1476_v15 }
 0x307   : > { %v1357_v54 = vpop.f32.mrf.mxu1  ;;  %v1397_v1 = vpop.f32.mrf.mxu0 }
 0x308   : > { %v1358_v6 = vadd.f32 %v1357_v54, %v1333_v59  ;;  %v1398_v10 = vadd.f32 %v1397_v1, %v1334_v63 }
 0x30e   : > { %v1377_v11 = vpop.f32.mrf.mxu3 }
 0x30f   : > { %v1378_v13 = vadd.f32 %v1377_v11, %v1358_v6  ;;  %v1417_v14 = vpop.f32.mrf.mxu1 }
 0x310   : > { %v1418_v17 = vadd.f32 %v1417_v14, %v1398_v10 }
 0x311   : > { %v1992_v18 = vmul.f32 -1.442695, %v1378_v13 }
 0x312   : > { %v1993_v19 = vmul.f32 -1.442695, %v1418_v17 }
 0x313   : > { %2130 = vpow2.f32 %v1992_v18 }
 0x314   : > { %2132 = vpow2.f32 %v1993_v19 }
 0x319   : > { %v2131_v20 = vpop.eup %2130 }
 0x31a   : > { %v2133_v21 = vpop.eup %2132  ;;  %v1426_v22 = vadd.f32 1.0, %v2131_v20 }
 0x31b   : > { %v1427_v23 = vadd.f32 1.0, %v2133_v21 }
 0x31c   : > { %2134 = vrcp.f32 %v1426_v22  ;;  %v1439_v29 = vand.u32 2147483648, %v1426_v22  ;;  %v1437_v32 = vand.u32 2147483647, %v1426_v22  ;;  %vm1433_vm14 = vweird.f32 %v1426_v22 }
 0x31d   : > { %2136 = vrcp.f32 %v1427_v23  ;;  %v1454_v33 = vand.u32 2147483648, %v1427_v23  ;;  %v1452_v35 = vand.u32 2147483647, %v1427_v23  ;;  %vm1448_vm0 = vweird.f32 %v1427_v23 }
 0x31e   : > { %v1440_v37 = vor.u32 1.1754944e-38, %v1439_v29  ;;  %vm1438_vm1 = vcmp.eq.f32.partialorder %v1437_v32, 8.507059e+37 }
 0x31f   : > { %v1455_v40 = vor.u32 1.1754944e-38, %v1454_v33  ;;  %vm1453_vm3 = vcmp.eq.f32.partialorder %v1452_v35, 8.507059e+37 }
 0x322   : > { %v2135_v24 = vpop.eup %2134 }
 0x323   : > { %v2137_v25 = vpop.eup %2136  ;;  %v1429_v26 = vmul.f32 %v2135_v24, %v1426_v22  ;;  %vm1434_vm12 = vweird.f32 %v2135_v24 }
 0x324   : > { %v1444_v27 = vmul.f32 %v2137_v25, %v1427_v23  ;;  %vm1449_vm13 = vweird.f32 %v2137_v25  ;;  %vm1435_vm15 = vmor %vm1433_vm14, %vm1434_vm12 }
 0x325   : > { %v1430_v28 = vsub.f32 1.0, %v1429_v26  ;;  %vm1450_vm2 = vmor %vm1448_vm0, %vm1449_vm13 }
 0x326   : > { %v1445_v30 = vsub.f32 1.0, %v1444_v27 }
 0x327   : > { %v1431_v31 = vmul.f32 %v2135_v24, %v1430_v28 }
 0x328   : > { %v1446_v34 = vmul.f32 %v2137_v25, %v1445_v30 }
 0x329   : > { %v1432_v36 = vadd.f32 %v2135_v24, %v1431_v31 }
 0x32a   : > { %v1447_v38 = vadd.f32 %v2137_v25, %v1446_v34 }
 0x32b   : > { %v1436_v39 = vsel %vm1435_vm15, %v2135_v24, %v1432_v36 }
 0x32c   : > { %v1441_v41 = vsel %vm1438_vm1, %v1440_v37, %v1436_v39  ;;  %v1451_v42 = vsel %vm1450_vm2, %v2137_v25, %v1447_v38 }
 0x32d   : > { %v1458_v43 = vmul.f32 %v1441_v41, %v1378_v13  ;;  %v1456_v44 = vsel %vm1453_vm3, %v1455_v40, %v1451_v42 }
 0x32e   : > { %v1459_v45 = vmul.f32 %v1456_v44, %v1418_v17 }
 0x32f   : > { %1508 = vmatmul.f32.vlgmr.msrb.gmra.mxu3 %v1458_v43  ;;  %1577 = vmatmul.f32.vlgmr.msrb.gmra.mxu2 %v1458_v43 }
 0x330   : > { %1994 = vmatmul.msk.f32.vlgmr.msra.gmra.mxu1 %vm926_vm10, %v1459_v45  ;;  %1995 = vmatmul.msk.f32.vlgmr.msra.gmra.mxu0 %vm926_vm10, %v1459_v45  ;;  %vm1649_vm10 = vcmask 39936  }
 0x3ad   : > { %v1529_v53 = vpop.f32.mrf.mxu1  ;;  %v1598_v54 = vpop.f32.mrf.mxu0 }
 0x3b2   : > { %v1509_v48 = vpop.f32.mrf.mxu3  ;;  %v1578_v49 = vpop.f32.mrf.mxu2 }
 0x3b3   : > { %v1510_v50 = vadd.f32 %v2102_v46, %v1509_v48  ;;  %v1579_v51 = vadd.f32 %v2103_v47, %v1578_v49 }
 0x3b5   : > { %v1530_v55 = vadd.f32 %v1529_v53, %v1510_v50  ;;  %v1599_v56 = vadd.f32 %v1598_v54, %v1579_v51 }
 0x3b7   : > { %v1606_v57 = vsub.f32 %v2104_v52, %v1599_v56  ;;  %1650 = vst.msk [vmem:[%s711_s3] sm:$0xff] %vm1649_vm10, %v1530_v55 }
 0x3b8   : > { %2385 = shalt.err (!%p2382_p8)
}
 0x3b9   : > { %2026 = dma.vmem_to_hbm [thread:$0]  (%p2596_p11), %s1673_s27, 128, %s1675_s2, %s1655_s12   ;;  %v1610_v58 = vand.u32 2147483647, %v1606_v57  ;;  %v1607_v5 = vmax.f32 %v1606_v57, 0.0  ;;  %vm1608_vm5 = vcmp.ne.f32.partialorder %v1606_v57, %v1606_v57  ;;  %v2105_v8 = vld [vmem:[#allocation13] ss:$0 sm:$0xff] }
 0x3ba   : > { %s3063_s10 = sld [smem:[#allocation37_spill]]  ;;  %s718_s16 = scalar_lea.vmem [#allocation15], %s2739_s14 }
 0x3bb   : > { %v1611_v59 = vsub.f32 0.0, %v1610_v58  ;;  %s1686_s19 = sshll.u32 %s718_s16, 4  ;;  %s1660_s3 = scalar_lea.sflag [#allocation16], %s2736_s8  ;;  %s1687_s19 = int_to_ptr.vmem [resolvable:$true] %s1686_s19 }
 0x3bd   : > { %v1612_v60 = vmul.f32 1.442695, %v1611_v59 }
 0x3bf   : > { %2138 = vpow2.f32 %v1612_v60 }
 0x3c0   : > { %s1684_s25 = scalar_lea.hbm %s3063_s10, %s1998_s23  ;;  %s2406_s23 = scalar_lea.hbm %s3063_s10, 40 }
 0x3c1   : > { %s1688_s6 = sshll.u32 %s1684_s25, 4  ;;  %s1689_s6 = int_to_ptr.hbm [resolvable:$true] %s1688_s6 }
 0x3c2   : > { %s2400_s27 = sshra.s32 %s1689_s6, 4  ;;  %s2401_s27 = int_to_ptr.hbm [resolvable:$true] %s2400_s27 }
 0x3c3   : > { %s2402_s2 = scalar_lea.hbm %s2401_s27, 8  ;;  %p2407_p3 = scmp.lt.s32.totalorder %s2401_s27, %s3063_s10 }
 0x3c4   : > { %p2403_p1 = scmp.ne.s32.totalorder %s2401_s27, %s2402_s2  ;;  %p2408_p7 = scmp.lt.s32.totalorder %s2406_s23, %s2402_s2 }
 0x3c5   : > { %v2139_v61 = vpop.eup %2138 }
 0x3c6   : > { %v1614_v62 = vadd.f32 1.0, %v2139_v61  ;;  %v1617_v63 = vmul.f32 -0.5, %v2139_v61  ;;  %v1620_v1 = vand.u32 2147483647, %v2139_v61  ;;  %p2404_p9 = pnand %p2403_p1, %p2596_p11  ;;  %p2409_p6 = por %p2408_p7, %p2407_p3 }
 0x3c8   : > { %2140 = vlog2.f32 %v1614_v62  ;;  %v1618_v0 = vadd.f32 1.0, %v1617_v63  ;;  %vm1621_vm4 = vcmp.lt.f32.partialorder %v1620_v1, 0.0004427343  ;;  %p2405_p13 = pneg %p2404_p9 }
 0x3ca   : > { %v1619_v4 = vmul.f32 %v2139_v61, %v1618_v0  ;;  %p2410_p10 = pnand %p2409_p6, %p2405_p13 }
 0x3ce   : > { %v2141_v2 = vpop.eup %2140 }
 0x3cf   : > { %v1616_v3 = vmul.f32 0.6931472, %v2141_v2 }
 0x3d1   : > { %v1622_v6 = vsel %vm1621_vm4, %v1619_v4, %v1616_v3 }
 0x3d2   : > { %v1623_v7 = vadd.f32 %v1622_v6, %v1607_v5 }
 0x3d4   : > { %v1624_v9 = vsel %vm1608_vm5, %v1606_v57, %v1623_v7 }
 0x3d5   : > { %v1625_v10 = vsub.f32 %v2104_v52, %v1624_v9 }
 0x3d7   : > { %v1629_v11 = vsub.f32 %v1625_v10, %v2105_v8 }
 0x3d9   : > { %v1633_v12 = vand.u32 2147483647, %v1629_v11  ;;  %v1630_v23 = vmax.f32 %v1629_v11, 0.0  ;;  %vm1631_vm7 = vcmp.ne.f32.partialorder %v1629_v11, %v1629_v11 }
 0x3db   : > { %v1634_v13 = vsub.f32 0.0, %v1633_v12 }
 0x3dd   : > { %v1635_v14 = vmul.f32 1.442695, %v1634_v13 }
 0x3df   : > { %2142 = vpow2.f32 %v1635_v14 }
 0x3e5   : > { %v2143_v15 = vpop.eup %2142 }
 0x3e6   : > { %v1637_v16 = vadd.f32 1.0, %v2143_v15  ;;  %v1640_v17 = vmul.f32 -0.5, %v2143_v15  ;;  %v1643_v19 = vand.u32 2147483647, %v2143_v15 }
 0x3e8   : > { %2144 = vlog2.f32 %v1637_v16  ;;  %v1641_v18 = vadd.f32 1.0, %v1640_v17  ;;  %vm1644_vm6 = vcmp.lt.f32.partialorder %v1643_v19, 0.0004427343 }
 0x3ea   : > { %v1642_v22 = vmul.f32 %v2143_v15, %v1641_v18 }
 0x3ee   : > { %v2145_v20 = vpop.eup %2144 }
 0x3ef   : > { %v1639_v21 = vmul.f32 0.6931472, %v2145_v20 }
 0x3f1   : > { %v1645_v24 = vsel %vm1644_vm6, %v1642_v22, %v1639_v21 }
 0x3f2   : > { %v1646_v25 = vadd.f32 %v1645_v24, %v1630_v23 }
 0x3f4   : > { %v1647_v26 = vsel %vm1631_vm7, %v1629_v11, %v1646_v25 }
 0x3f5   : > { %v1648_v27 = vadd.f32 %v2105_v8, %v1647_v26 }
 0x3f7   : > { %v1651_v28 = vmul.f32 1.442695, %v1648_v27 }
 0x3f9   : > { %2146 = vpow2.f32 %v1651_v28 }
 0x3ff   : > { %v2147_v29 = vpop.eup %2146 }
 0x400   : > { %1653 = vst.msk [vmem:[%s718_s16] sm:$0xff] %vm1649_vm10, %v2147_v29 }
 0x401   : > { %2413 = shalt.err (!%p2410_p10)
}
 0x402   : > { %2027 = dma.vmem_to_hbm [thread:$0]  (%p2596_p11), %s1687_s19, 128, %s1689_s6, %s1660_s3  }
 0x403 PF: > { %s3064_s8 = sld [smem:[#allocation23_spill]]  ;;  %p2065_p0 = scmp.ge.s32.totalorder %s2468_s28, 2 }
 0x405   : > { %p2054_p2 = pnand %p2065_p0, %p2600_p12 }
 0x407   : > { %p2055_p4 = pneg %p2054_p2 }
 0x409   : > { %s1700_s22 = sand.u32 1, %s3064_s8  }
 0x40a   : > { %s1701_s24 = scalar_lea.sflag [#allocation4], %s1700_s22 }
 0x40b   : > { %2447 = dma.done.wait (%p2055_p4), %s1701_s24, 128  }
 0x40c   : > { %2449 = vsyncadd (%p2055_p4), %s1701_s24, 4294967168  ;;  %s1711_s4 = scalar_lea.sflag [#allocation16], %s1700_s22 }
 0x40d   : > { %2451 = dma.done.wait (%p2055_p4), %s1711_s4, 128  }
 0x40e   : > { %2453 = vsyncadd (%p2055_p4), %s1711_s4, 4294967168  ;;  %s3066_s28 = sld [smem:[#allocation25_spill]]  ;;  %s3069_s25 = smov %s2460_s26 }
 0x40f   : > { %s3067_s18 = sld [smem:[#allocation24_spill]] }
 0x410   : > { %s3068_s27 = sld [smem:[#allocation26_spill]] }
 0x414   : > { %p37_p11 = scmp.ge.s32.totalorder %s3066_s28, 7  }
 0x415   : > { %s3070_s26 = smov %s3067_s18 }
 0x416   :  { %39 = sbr.rel (!%p37_p11) target bundleno = 22 (0x16), region = 204 }
 0x41b   :  { %1717 = vsyncpa [#allocation3], 1 }
 0x41c   :  { %1719 = vsyncpa [#allocation3 + $0x1], 1 }
 0x41d   :  { %1720 = vsyncpa [#allocation6], 1 }
 0x41e   :  { %1722 = vsyncpa [#allocation6 + $0x1], 1 }
 0x41f   :  { %1723 = vsyncpa [#allocation9], 1 }
 0x420   :  { %1725 = vsyncpa [#allocation9 + $0x1], 1 }
 0x421   :  { %1726 = vsyncpa [#allocation12], 1 }
 0x422   :  { %1727 = vsyncpa [#allocation4], 1 }
 0x423   :  { %1729 = vsyncpa [#allocation4 + $0x1], 1 }
 0x424   :  { %1730 = vsyncpa [#allocation16], 1 }
 0x425   :  { %1732 = vsyncpa [#allocation16 + $0x1], 1 }

</bundles_post_ra>
